<compile_context>
chip_gen: v7x
topology: tpu7x:2x2x1
jax: 0.10.0
libtpu: 0.0.40
codegen_flags: <defaults>
</compile_context>

<pallas_src>
import functools
import math

import jax
import jax.numpy as jnp
from jax.experimental import pallas as pl
from jax.experimental.pallas import tpu as pltpu

EPS = 1.1920929e-07                 # torch.finfo(torch.float32).eps (nn.RMSNorm default eps)
LANE = 128                          # TPU vreg lane width
ATTN_WEIGHTS_DTYPE = jnp.float32    # set to jnp.bfloat16 to halve the largest HBM write stream


def _round_up(x, m):
    return ((x + m - 1) // m) * m


def _rmsnorm(x, g):
    # x: (N, E) f32, g: (1, E) f32 — vector math stays f32 (v5e has no bf16 VPU/EUP path).
    ms = jnp.mean(x * x, axis=-1, keepdims=True)
    return x * jax.lax.rsqrt(ms + EPS) * g


def _vmem_limit_bytes():
    cap = 64 * 1024 * 1024          # conservative default = v7x per-core physical VMEM
    try:
        info = pltpu.get_tpu_info()
        cap = int(getattr(info, "vmem_capacity_bytes", cap))
    except Exception:
        pass
    cap = min(cap, 128 * 1024 * 1024)
    return int(cap * 0.85)          # ~15% headroom for compiler-internal scratch


# ----------------------------------------------------------------------------
# Kernel 1: all transformer blocks.  grid = (batch_tile, layer); the layer axis is
# sequential ("arbitrary"); the residual stream lives in VMEM scratch across layers.
# ----------------------------------------------------------------------------
def transformer_layers_kernel(x_ref, g1_ref, wqkv_ref, wo_ref, g2_ref, w13_ref, w2_ref,
                              gf_ref, xo_ref, attn_ref, x_sc, ctx_sc,
                              *, num_heads, d_key, d_key_p, d_value_p, d_ff_p):
    layer = pl.program_id(1)
    num_layers = pl.num_programs(1)
    H, dkp, dvp, dffp = num_heads, d_key_p, d_value_p, d_ff_p
    Bt, T, E = x_ref.shape
    N = Bt * T

    # Residual stream loaded once per batch tile; stays VMEM-resident across the layer axis.
    @pl.when(layer == 0)
    def _():
        x_sc[...] = x_ref[...].reshape(N, E)

    x = x_sc[...]                                      # (Bt*T, E) f32

    # ---- multi-head attention (pre-norm, causal) ----
    h_bf = _rmsnorm(x, g1_ref[...]).astype(jnp.bfloat16)
    # Fused lane-dense Q|K|V projection; cast to bf16 ONCE (not per head).
    qkv = jnp.dot(h_bf, wqkv_ref[...],
                  preferred_element_type=jnp.float32).astype(jnp.bfloat16)
    dq = H * dkp

    scale = 1.0 / math.sqrt(d_key)                     # scale uses the *unpadded* d_key
    row = jax.lax.broadcasted_iota(jnp.int32, (T, T), 0)
    col = jax.lax.broadcasted_iota(jnp.int32, (T, T), 1)
    causal = row >= col

    # Static unroll: B_tile and H are tiny here.  For H >= 8 / long T, switch to a
    # lax.fori_loop with pl.ds(h * dkp, dkp) (offsets are 128-aligned) to bound live ranges.
    for b in range(Bt):
        rows = slice(b * T, (b + 1) * T)
        for h in range(H):
            qh = qkv[rows, h * dkp:(h + 1) * dkp]                       # lane-aligned slices
            kh = qkv[rows, dq + h * dkp: dq + (h + 1) * dkp]
            vh = qkv[rows, 2 * dq + h * dvp: 2 * dq + (h + 1) * dvp]
            # scores = q @ k.T via transposed-contraction dot_general (no explicit transpose)
            scores = jax.lax.dot_general(
                qh, kh, dimension_numbers=(((1,), (1,)), ((), ())),
                preferred_element_type=jnp.float32) * scale
            scores = jnp.where(causal, scores, -1e30)
            scores = scores - jnp.max(scores, axis=-1, keepdims=True)
            p = jnp.exp(scores)                                         # f32 softmax
            inv = pl.reciprocal(jnp.sum(p, axis=-1, keepdims=True), approx=False)
            attn = p * inv                                              # rows sum to 1
            attn_ref[b, h] = attn.astype(attn_ref.dtype)
            # per-head context written into its lane-aligned slice of the VMEM slab
            ctx_sc[rows, h * dvp:(h + 1) * dvp] = jnp.dot(
                attn.astype(jnp.bfloat16), vh, preferred_element_type=jnp.float32)

    attn_out = jnp.dot(ctx_sc[...].astype(jnp.bfloat16), wo_ref[...],
                       preferred_element_type=jnp.float32)
    x1 = x + attn_out

    # ---- SwiGLU feed-forward (pre-norm); gate|up fused into one matmul ----
    h2 = _rmsnorm(x1, g2_ref[...]).astype(jnp.bfloat16)
    ab = jnp.dot(h2, w13_ref[...], preferred_element_type=jnp.float32)   # (N, 2*dffp)
    a = ab[:, :dffp]
    bgate = ab[:, dffp:]
    ff = jnp.dot((jax.nn.silu(a) * bgate).astype(jnp.bfloat16), w2_ref[...],
                 preferred_element_type=jnp.float32)
    x_new = x1 + ff
    x_sc[...] = x_new

    # Epilogue: fold the final RMSNorm here so the output projection does no redundant
    # per-vocab-tile normalization; hand the activation over in bf16 (half HBM round trip).
    @pl.when(layer == num_layers - 1)
    def _():
        xo_ref[...] = _rmsnorm(x_new, gf_ref[...]).astype(jnp.bfloat16).reshape(Bt, T, E)
    # TODO(synk): dropout omitted (eval-mode forward); padding_mask path not implemented.


# ----------------------------------------------------------------------------
# Kernel 2: weight-tied output projection, tiled over (batch_tile, vocab).
# ----------------------------------------------------------------------------
def output_proj_kernel(x_ref, wemb_ref, o_ref):
    Bt, T, E = x_ref.shape
    h = x_ref[...].reshape(Bt * T, E)                  # already final-RMSNorm'ed, bf16
    logits = jax.lax.dot_general(
        h, wemb_ref[...], dimension_numbers=(((1,), (1,)), ((), ())),
        preferred_element_type=jnp.float32)
    o_ref[...] = logits.reshape(o_ref.shape)


# ----------------------------------------------------------------------------
# Tile / budget helpers
# ----------------------------------------------------------------------------
def _pick_b_tile(B, T, E, H, dkp, dvp, dffp, budget):
    """Largest divisor of B whose per-grid-step working set fits the VMEM budget."""
    dqkv = H * (2 * dkp + dvp)
    attn_b = 4 if ATTN_WEIGHTS_DTYPE == jnp.float32 else 2
    w_bytes = 2 * (E * dqkv + H * dvp * E + E * 2 * dffp + dffp * E) * 2   # dbl-buffered bf16
    for bt in range(B, 0, -1):
        if B % bt:
            continue
        n = bt * T
        act = (2 * n * E * 4                   # x input block (f32, double buffered)
               + 2 * n * E * 2                 # xo output block (bf16, double buffered)
               + 2 * bt * H * T * T * attn_b   # attention-weights output block (dbl buffered)
               + n * E * 4 + n * H * dvp * 4   # residual + ctx scratch
               + n * (dqkv + 2 * dffp) * 6     # rough in-kernel temporaries (f32 + bf16)
               + 4 * T * T * 4)
        if w_bytes + act <= budget:
            return bt
    return 1


def _vocab_tile(V, bt, T, E, budget):
    if V % LANE != 0:
        return V                               # small / ragged vocab: one full-width tile
    tv = min(V, 4096)
    tv -= tv % LANE
    while tv > LANE:
        if V % tv == 0:
            need = 2 * (bt * T * tv * 4 + tv * E * 2) + 2 * bt * T * E * 2
            if need <= budget:
                return tv
        tv -= LANE
    return LANE


def _pick_out_tiles(B, T, E, V, budget):
    for bt in range(B, 0, -1):
        if B % bt:
            continue
        tv = _vocab_tile(V, bt, T, E, budget)
        need = 2 * (bt * T * tv * 4 + tv * E * 2 + bt * T * E * 2)
        if need <= budget:
            return bt, tv
    return 1, _vocab_tile(V, 1, T, E, budget)


# ----------------------------------------------------------------------------
# Wrappers
# ----------------------------------------------------------------------------
def run_transformer_layers(x, layer_params, final_g, *, num_heads, d_key, vmem_limit):
    B, T, E = x.shape
    g1, wqkv, wo, g2, w13, w2 = layer_params
    L, H = g1.shape[0], num_heads
    dqkv = wqkv.shape[-1]
    hdv = wo.shape[1]                       # H * dvp
    dvp = hdv // H
    dkp = (dqkv - hdv) // (2 * H)
    dffp = w13.shape[-1] // 2

    bt = _pick_b_tile(B, T, E, H, dkp, dvp, dffp, int(vmem_limit * 0.9))
    # TODO(synk): for very large E/d_ff on v7x (64 MiB), additionally tile wqkv/w13/w2 over
    # their output dims (extra inner grid axis) so double-buffered weight prefetch survives.
    # Note: bt == B maximizes weight reuse but leaves only one batch tile for megacore; on
    # multi-core parts with B > 1 a smaller bt trades weight DMA for core parallelism.

    kernel = functools.partial(transformer_layers_kernel, num_heads=H, d_key=d_key,
                               d_key_p=dkp, d_value_p=dvp, d_ff_p=dffp)
    in_specs = [
        pl.BlockSpec((bt, T, E), lambda b, l: (b, 0, 0)),            # x (resident across l)
        pl.BlockSpec((None, 1, E), lambda b, l: (l, 0, 0)),          # g1
        pl.BlockSpec((None, E, dqkv), lambda b, l: (l, 0, 0)),       # wqkv (bf16)
        pl.BlockSpec((None, hdv, E), lambda b, l: (l, 0, 0)),        # wo   (bf16)
        pl.BlockSpec((None, 1, E), lambda b, l: (l, 0, 0)),          # g2
        pl.BlockSpec((None, E, 2 * dffp), lambda b, l: (l, 0, 0)),   # w13  (bf16)
        pl.BlockSpec((None, dffp, E), lambda b, l: (l, 0, 0)),       # w2   (bf16)
        pl.BlockSpec((1, E), lambda b, l: (0, 0)),                   # final RMSNorm gain
    ]
    out_specs = (
        pl.BlockSpec((bt, T, E), lambda b, l: (b, 0, 0)),                 # normalized residual
        pl.BlockSpec((bt, None, H, T, T), lambda b, l: (b, l, 0, 0, 0)),  # attention weights
    )
    out_shape = (
        jax.ShapeDtypeStruct((B, T, E), jnp.bfloat16),
        jax.ShapeDtypeStruct((B, L, H, T, T), ATTN_WEIGHTS_DTYPE),
    )
    return pl.pallas_call(
        kernel,
        grid=(B // bt, L),
        in_specs=in_specs,
        out_specs=out_specs,
        out_shape=out_shape,
        scratch_shapes=[pltpu.VMEM((bt * T, E), jnp.float32),        # residual stream
                        pltpu.VMEM((bt * T, hdv), jnp.float32)],     # per-head ctx slab
        compiler_params=pltpu.CompilerParams(
            dimension_semantics=("parallel", "arbitrary"),
            vmem_limit_bytes=vmem_limit),
    )(x, g1, wqkv, wo, g2, w13, w2, final_g)


def run_output_proj(x_norm, tok_emb, *, vmem_limit):
    B, T, E = x_norm.shape
    V = tok_emb.shape[0]
    bt, tv = _pick_out_tiles(B, T, E, V, int(vmem_limit * 0.9))
    wemb = tok_emb.astype(jnp.bfloat16)    # weight-tied; rows indexed directly, no transpose
    return pl.pallas_call(
        output_proj_kernel,
        grid=(B // bt, V // tv),
        in_specs=[pl.BlockSpec((bt, T, E), lambda b, v: (b, 0, 0)),
                  pl.BlockSpec((tv, E), lambda b, v: (v, 0))],
        out_specs=pl.BlockSpec((bt, T, tv), lambda b, v: (b, 0, v)),
        out_shape=jax.ShapeDtypeStruct((B, T, V), jnp.float32),
        compiler_params=pltpu.CompilerParams(
            dimension_semantics=("parallel", "parallel"),
            vmem_limit_bytes=vmem_limit),
    )(x_norm, wemb)


def init_params(key, *, vocab_size, embedding_size, context_size,
                num_layers, num_heads, d_key, d_value, d_ff):
    E, H = embedding_size, num_heads
    dkp = _round_up(d_key, LANE)
    dvp = _round_up(d_value, LANE)
    dffp = _round_up(d_ff, LANE)
    keys = jax.random.split(key, 2 + num_layers)
    tok_emb = 0.02 * jax.random.normal(keys[0], (vocab_size, E), jnp.float32)
    pos_emb = 0.02 * jax.random.normal(keys[1], (context_size, E), jnp.float32)

    def pad_last(w, n):
        return jnp.pad(w, [(0, 0)] * (w.ndim - 1) + [(0, n - w.shape[-1])])

    g1s, wqkvs, wos, g2s, w13s, w2s = [], [], [], [], [], []
    for l in range(num_layers):
        ks = jax.random.split(keys[2 + l], 7)
        wq = 0.02 * jax.random.normal(ks[0], (E, H, d_key), jnp.float32)
        wk = 0.02 * jax.random.normal(ks[1], (E, H, d_key), jnp.float32)
        wv = 0.02 * jax.random.normal(ks[2], (E, H, d_value), jnp.float32)
        wo = 0.02 * jax.random.normal(ks[3], (H, d_value, E), jnp.float32)
        w1 = 0.02 * jax.random.normal(ks[4], (E, d_ff), jnp.float32)   # SwiGLU gate
        w3 = 0.02 * jax.random.normal(ks[5], (E, d_ff), jnp.float32)   # SwiGLU up
        w2 = 0.02 * jax.random.normal(ks[6], (d_ff, E), jnp.float32)   # SwiGLU down
        # Zero-pad each head's q/k/v channels (and d_ff) to 128-lane multiples so every
        # per-head slice in the kernel is lane-aligned.  Zero padding is a no-op math-wise.
        wq_p = pad_last(wq, dkp).reshape(E, H * dkp)
        wk_p = pad_last(wk, dkp).reshape(E, H * dkp)
        wv_p = pad_last(wv, dvp).reshape(E, H * dvp)
        wo_p = jnp.pad(wo, ((0, 0), (0, dvp - d_value), (0, 0))).reshape(H * dvp, E)
        g1s.append(jnp.ones((1, E), jnp.float32))
        g2s.append(jnp.ones((1, E), jnp.float32))
        wqkvs.append(jnp.concatenate([wq_p, wk_p, wv_p], axis=-1))          # fused Q|K|V
        wos.append(wo_p)
        w13s.append(jnp.concatenate([pad_last(w1, dffp), pad_last(w3, dffp)], axis=-1))
        w2s.append(jnp.pad(w2, ((0, dffp - d_ff), (0, 0))))
    return {
        "tok_emb": tok_emb,
        "pos_emb": pos_emb,
        "final_g": jnp.ones((1, E), jnp.float32),
        "layers": (
            jnp.stack(g1s),                               # (L, 1, E)              f32
            jnp.stack(wqkvs).astype(jnp.bfloat16),        # (L, E, H*(2dkp+dvp))   bf16
            jnp.stack(wos).astype(jnp.bfloat16),          # (L, H*dvp, E)          bf16
            jnp.stack(g2s),                               # (L, 1, E)              f32
            jnp.stack(w13s).astype(jnp.bfloat16),         # (L, E, 2*dffp)         bf16
            jnp.stack(w2s).astype(jnp.bfloat16),          # (L, dffp, E)           bf16
        ),
    }


def transformer_forward(token_ids, params, *, num_heads, d_key, d_value, d_ff):
    del d_value, d_ff   # padded sizes are derived from the packed weight shapes
    B, T = token_ids.shape
    E = params["tok_emb"].shape[1]
    # Embedding gather kept in plain JAX (glue).
    x = (params["tok_emb"][token_ids] * math.sqrt(E)
         + params["pos_emb"][:T][None, :, :]).astype(jnp.float32)
    vmem_limit = _vmem_limit_bytes()
    x_norm, attn_weights = run_transformer_layers(
        x, params["layers"], params["final_g"],
        num_heads=num_heads, d_key=d_key, vmem_limit=vmem_limit)        # (B,T,E) bf16 normed
    logits = run_output_proj(x_norm, params["tok_emb"], vmem_limit=vmem_limit)  # (B,T,V)
    return logits, attn_weights


# ----------------------------------------------------------------------------
# Pure-JAX reference (same packed/padded weights, all-f32 math) for correctness check.
# ----------------------------------------------------------------------------
def transformer_reference(token_ids, params, *, num_heads, d_key):
    tok_emb, pos_emb = params["tok_emb"], params["pos_emb"]
    g1, wqkv, wo, g2, w13, w2 = params["layers"]
    B, T = token_ids.shape
    E = tok_emb.shape[1]
    H = num_heads
    L = g1.shape[0]
    hdv = wo.shape[1]
    dvp = hdv // H
    dkp = (wqkv.shape[-1] - hdv) // (2 * H)
    dffp = w13.shape[-1] // 2

    def rms(v, g):
        return v * jax.lax.rsqrt(jnp.mean(v * v, axis=-1, keepdims=True) + EPS) * g

    x = tok_emb[token_ids] * math.sqrt(E) + pos_emb[:T][None]
    mask = jnp.tril(jnp.ones((T, T), bool))
    attn_all = []
    for l in range(L):
        h = rms(x, g1[l])
        qkv = h @ wqkv[l].astype(jnp.float32)
        q = qkv[..., :H * dkp].reshape(B, T, H, dkp)
        k = qkv[..., H * dkp:2 * H * dkp].reshape(B, T, H, dkp)
        v = qkv[..., 2 * H * dkp:].reshape(B, T, H, dvp)
        scores = jnp.einsum("bqhd,bkhd->bhqk", q, k) / math.sqrt(d_key)
        scores = jnp.where(mask, scores, -1e30)
        attn = jax.nn.softmax(scores, axis=-1)
        attn_all.append(attn)
        ctx = jnp.einsum("bhqk,bkhd->bqhd", attn, v).reshape(B, T, hdv)
        x = x + ctx @ wo[l].astype(jnp.float32)
        h2 = rms(x, g2[l])
        ab = h2 @ w13[l].astype(jnp.float32)
        x = x + (jax.nn.silu(ab[..., :dffp]) * ab[..., dffp:]) @ w2[l].astype(jnp.float32)
    logits = rms(x, params["final_g"]) @ tok_emb.T
    return logits, jnp.stack(attn_all, axis=1)


if __name__ == "__main__":
    # Small deterministic config.
    vocab_size, embedding_size, context_size = 64, 32, 16
    num_layers, num_heads, d_key, d_value, d_ff = 2, 2, 16, 16, 64
    batch_size, seq_len = 2, 16

    key = jax.random.PRNGKey(0)
    k_tok, k_par = jax.random.split(key)
    token_ids = jax.random.randint(k_tok, (batch_size, seq_len), 0, vocab_size,
                                   dtype=jnp.int32)
    params = init_params(k_par, vocab_size=vocab_size, embedding_size=embedding_size,
                         context_size=context_size, num_layers=num_layers,
                         num_heads=num_heads, d_key=d_key, d_value=d_value, d_ff=d_ff)

    logits, attn_weights = transformer_forward(
        token_ids, params, num_heads=num_heads, d_key=d_key, d_value=d_value, d_ff=d_ff)
    jax.block_until_ready((logits, attn_weights))

    assert logits.shape == (batch_size, seq_len, vocab_size)
    assert attn_weights.shape == (batch_size, num_layers, num_heads, seq_len, seq_len)
    # attention rows must sum to 1 (f32 softmax + exact reciprocal)
    assert bool(jnp.allclose(jnp.sum(attn_weights.astype(jnp.float32), axis=-1), 1.0,
                             atol=1e-4))

    # Cross-check against the pure-JAX reference (loose tolerance: activations pass through
    # bf16 on the MXU inside the kernel; weights are identical).
    logits_ref, attn_ref = transformer_reference(token_ids, params,
                                                 num_heads=num_heads, d_key=d_key)
    assert bool(jnp.allclose(attn_weights.astype(jnp.float32), attn_ref, atol=5e-3))
    assert bool(jnp.allclose(logits, logits_ref, atol=1e-2, rtol=1e-2))
    print("KERNEL_OK")
</pallas_src>

<mosaic_0001>
module attributes {stable_mosaic.version = 11 : i64} {
  func.func @transformer_layers_kernel(%arg0: i32, %arg1: i32, %arg2: memref<2x16x32xf32, #tpu.memory_space<vmem>>, %arg3: memref<1x1x32xf32, #tpu.memory_space<vmem>>, %arg4: memref<1x32x768xbf16, #tpu.memory_space<vmem>>, %arg5: memref<1x256x32xbf16, #tpu.memory_space<vmem>>, %arg6: memref<1x1x32xf32, #tpu.memory_space<vmem>>, %arg7: memref<1x32x256xbf16, #tpu.memory_space<vmem>>, %arg8: memref<1x128x32xbf16, #tpu.memory_space<vmem>>, %arg9: memref<1x32xf32, #tpu.memory_space<vmem>>, %arg10: memref<2x16x32xbf16, #tpu.memory_space<vmem>>, %arg11: memref<2x1x2x16x16xf32, #tpu.memory_space<vmem>>, %arg12: memref<32x32xf32, #tpu.memory_space<vmem>>, %arg13: memref<32x256xf32, #tpu.memory_space<vmem>>) attributes {dimension_semantics = [#tpu.dimension_semantics<parallel>, #tpu.dimension_semantics<arbitrary>], iteration_bounds = array<i64: 1, 2>, scalar_prefetch = 0 : i64, scratch_operands = 2 : i64, tpu.core_type = #tpu.core_type<tc>, window_params = [{transform_indices = @transform_0, window_bounds = array<i64: 2, 16, 32>}, {transform_indices = @transform_1, window_bounds = array<i64: 1, 1, 32>}, {transform_indices = @transform_2, window_bounds = array<i64: 1, 32, 768>}, {transform_indices = @transform_3, window_bounds = array<i64: 1, 256, 32>}, {transform_indices = @transform_4, window_bounds = array<i64: 1, 1, 32>}, {transform_indices = @transform_5, window_bounds = array<i64: 1, 32, 256>}, {transform_indices = @transform_6, window_bounds = array<i64: 1, 128, 32>}, {pipeline_mode = #tpu.pipeline_mode<synchronous>, transform_indices = @transform_7, window_bounds = array<i64: 1, 32>}, {transform_indices = @transform_8, window_bounds = array<i64: 2, 16, 32>}, {transform_indices = @transform_9, window_bounds = array<i64: 2, 1, 2, 16, 16>}]} {
    %c0_i32 = arith.constant 0 : i32
    %0 = arith.cmpi eq, %arg1, %c0_i32 : i32
    %1 = arith.extui %0 : i1 to i32
    %c0_i32_0 = arith.constant 0 : i32
    %2 = arith.cmpi ne, %1, %c0_i32_0 : i32
    scf.if %2 {
      %c0_84 = arith.constant 0 : index
      %c0_85 = arith.constant 0 : index
      %c0_86 = arith.constant 0 : index
      %164 = vector.load %arg2[%c0_84, %c0_85, %c0_86] : memref<2x16x32xf32, #tpu.memory_space<vmem>>, vector<2x16x32xf32>
      %165 = vector.shape_cast %164 : vector<2x16x32xf32> to vector<32x32xf32>
      %c0_87 = arith.constant 0 : index
      %c0_88 = arith.constant 0 : index
      %166 = vector.load %arg12[%c0_87, %c0_88] : memref<32x32xf32, #tpu.memory_space<vmem>>, vector<32x32xf32>
      tpu.vector_store %arg12[%c0_87, %c0_88], %165 {strides = array<i32>} : memref<32x32xf32, #tpu.memory_space<vmem>>, vector<32x32xf32>,
    } else {
    }
    %c0 = arith.constant 0 : index
    %c0_1 = arith.constant 0 : index
    %3 = vector.load %arg12[%c0, %c0_1] : memref<32x32xf32, #tpu.memory_space<vmem>>, vector<32x32xf32>
    %c0_2 = arith.constant 0 : index
    %c0_3 = arith.constant 0 : index
    %c0_4 = arith.constant 0 : index
    %4 = vector.load %arg3[%c0_2, %c0_3, %c0_4] : memref<1x1x32xf32, #tpu.memory_space<vmem>>, vector<1x1x32xf32>
    %5 = vector.shape_cast %4 : vector<1x1x32xf32> to vector<1x32xf32>
    %6 = arith.mulf %3, %3 : vector<32x32xf32>
    %cst = arith.constant dense<0.000000e+00> : vector<32xf32>
    %7 = vector.multi_reduction <add>, %6, %cst [1] : vector<32x32xf32> to vector<32xf32>
    %8 = vector.shape_cast %7 : vector<32xf32> to vector<32x1xf32>
    %cst_5 = arith.constant 3.200000e+01 : f32
    %9 = vector.broadcast %cst_5 : f32 to vector<32x1xf32>
    %10 = arith.divf %8, %9 : vector<32x1xf32>
    %cst_6 = arith.constant 1.1920929E-7 : f32
    %11 = vector.broadcast %cst_6 : f32 to vector<32x1xf32>
    %12 = arith.addf %10, %11 : vector<32x1xf32>
    %13 = math.rsqrt %12 : vector<32x1xf32>
    %14 = vector.broadcast %13 : vector<32x1xf32> to vector<32x32xf32>
    %15 = arith.mulf %3, %14 : vector<32x32xf32>
    %16 = vector.broadcast %5 : vector<1x32xf32> to vector<32x32xf32>
    %17 = arith.mulf %15, %16 : vector<32x32xf32>
    %18 = arith.truncf %17 : vector<32x32xf32> to vector<32x32xbf16>
    %c0_7 = arith.constant 0 : index
    %c0_8 = arith.constant 0 : index
    %c0_9 = arith.constant 0 : index
    %19 = vector.load %arg4[%c0_7, %c0_8, %c0_9] : memref<1x32x768xbf16, #tpu.memory_space<vmem>>, vector<1x32x768xbf16>
    %20 = vector.shape_cast %19 : vector<1x32x768xbf16> to vector<32x768xbf16>
    %cst_10 = arith.constant dense<0.000000e+00> : vector<32x768xf32>
    %21 = tpu.matmul %18, %20, %cst_10 {dimension_numbers = #tpu.dot_dimension_numbers<[1], [0], [0], [1], [0, 0, 1, 1], [], []>} : vector<32x32xbf16>, vector<32x768xbf16>, vector<32x768xf32> -> vector<32x768xf32>
    %22 = arith.truncf %21 : vector<32x768xf32> to vector<32x768xbf16>
    %23 = tpu.iota {dimensions = array<i32: 0>} : vector<16x16xi32>
    %24 = tpu.iota {dimensions = array<i32: 1>} : vector<16x16xi32>
    %25 = arith.cmpi sge, %23, %24 : vector<16x16xi32>
    %26 = vector.extract_strided_slice %22 {offsets = [0, 0], sizes = [16, 128], strides = [1, 1]} : vector<32x768xbf16> to vector<16x128xbf16>
    %27 = vector.extract_strided_slice %22 {offsets = [0, 256], sizes = [16, 128], strides = [1, 1]} : vector<32x768xbf16> to vector<16x128xbf16>
    %28 = vector.extract_strided_slice %22 {offsets = [0, 512], sizes = [16, 128], strides = [1, 1]} : vector<32x768xbf16> to vector<16x128xbf16>
    %cst_11 = arith.constant dense<0.000000e+00> : vector<16x16xf32>
    %29 = tpu.matmul %26, %27, %cst_11 {dimension_numbers = #tpu.dot_dimension_numbers<[1], [1], [0], [0], [0, 0, 1, 0], [], []>} : vector<16x128xbf16>, vector<16x128xbf16>, vector<16x16xf32> -> vector<16x16xf32>
    %cst_12 = arith.constant 2.500000e-01 : f32
    %30 = vector.broadcast %cst_12 : f32 to vector<16x16xf32>
    %31 = arith.mulf %29, %30 : vector<16x16xf32>
    %cst_13 = arith.constant -1.000000e+30 : f32
    %32 = vector.broadcast %cst_13 : f32 to vector<16x16xf32>
    %33 = arith.select %25, %31, %32 : vector<16x16xi1>, vector<16x16xf32>
    %cst_14 = arith.constant dense<0xFF800000> : vector<16xf32>
    %34 = vector.multi_reduction <maximumf>, %33, %cst_14 [1] : vector<16x16xf32> to vector<16xf32>
    %35 = vector.shape_cast %34 : vector<16xf32> to vector<16x1xf32>
    %36 = vector.broadcast %35 : vector<16x1xf32> to vector<16x16xf32>
    %37 = arith.subf %33, %36 : vector<16x16xf32>
    %38 = math.exp %37 : vector<16x16xf32>
    %cst_15 = arith.constant dense<0.000000e+00> : vector<16xf32>
    %39 = vector.multi_reduction <add>, %38, %cst_15 [1] : vector<16x16xf32> to vector<16xf32>
    %40 = vector.shape_cast %39 : vector<16xf32> to vector<16x1xf32>
    %41 = tpu.reciprocal %40 : vector<16x1xf32> -> vector<16x1xf32>
    %42 = vector.broadcast %41 : vector<16x1xf32> to vector<16x16xf32>
    %43 = arith.mulf %38, %42 : vector<16x16xf32>
    %c0_16 = arith.constant 0 : index
    %c0_17 = arith.constant 0 : index
    %c0_18 = arith.constant 0 : index
    %c0_19 = arith.constant 0 : index
    %c0_20 = arith.constant 0 : index
    %44 = vector.load %arg11[%c0_16, %c0_17, %c0_18, %c0_19, %c0_20] : memref<2x1x2x16x16xf32, #tpu.memory_space<vmem>>, vector<1x1x1x16x16xf32>
    %45 = vector.shape_cast %44 : vector<1x1x1x16x16xf32> to vector<16x16xf32>
    %46 = vector.shape_cast %43 : vector<16x16xf32> to vector<1x1x1x16x16xf32>
    tpu.vector_store %arg11[%c0_16, %c0_17, %c0_18, %c0_19, %c0_20], %46 {strides = array<i32>} : memref<2x1x2x16x16xf32, #tpu.memory_space<vmem>>, vector<1x1x1x16x16xf32>,
    %47 = arith.truncf %43 : vector<16x16xf32> to vector<16x16xbf16>
    %cst_21 = arith.constant dense<0.000000e+00> : vector<16x128xf32>
    %48 = tpu.matmul %47, %28, %cst_21 {dimension_numbers = #tpu.dot_dimension_numbers<[1], [0], [0], [1], [0, 0, 1, 1], [], []>} : vector<16x16xbf16>, vector<16x128xbf16>, vector<16x128xf32> -> vector<16x128xf32>
    %c0_22 = arith.constant 0 : index
    %c0_23 = arith.constant 0 : index
    %49 = vector.load %arg13[%c0_22, %c0_23] : memref<32x256xf32, #tpu.memory_space<vmem>>, vector<16x128xf32>
    tpu.vector_store %arg13[%c0_22, %c0_23], %48 {strides = array<i32>} : memref<32x256xf32, #tpu.memory_space<vmem>>, vector<16x128xf32>,
    %50 = vector.extract_strided_slice %22 {offsets = [0, 128], sizes = [16, 128], strides = [1, 1]} : vector<32x768xbf16> to vector<16x128xbf16>
    %51 = vector.extract_strided_slice %22 {offsets = [0, 384], sizes = [16, 128], strides = [1, 1]} : vector<32x768xbf16> to vector<16x128xbf16>
    %52 = vector.extract_strided_slice %22 {offsets = [0, 640], sizes = [16, 128], strides = [1, 1]} : vector<32x768xbf16> to vector<16x128xbf16>
    %cst_24 = arith.constant dense<0.000000e+00> : vector<16x16xf32>
    %53 = tpu.matmul %50, %51, %cst_24 {dimension_numbers = #tpu.dot_dimension_numbers<[1], [1], [0], [0], [0, 0, 1, 0], [], []>} : vector<16x128xbf16>, vector<16x128xbf16>, vector<16x16xf32> -> vector<16x16xf32>
    %cst_25 = arith.constant 2.500000e-01 : f32
    %54 = vector.broadcast %cst_25 : f32 to vector<16x16xf32>
    %55 = arith.mulf %53, %54 : vector<16x16xf32>
    %cst_26 = arith.constant -1.000000e+30 : f32
    %56 = vector.broadcast %cst_26 : f32 to vector<16x16xf32>
    %57 = arith.select %25, %55, %56 : vector<16x16xi1>, vector<16x16xf32>
    %cst_27 = arith.constant dense<0xFF800000> : vector<16xf32>
    %58 = vector.multi_reduction <maximumf>, %57, %cst_27 [1] : vector<16x16xf32> to vector<16xf32>
    %59 = vector.shape_cast %58 : vector<16xf32> to vector<16x1xf32>
    %60 = vector.broadcast %59 : vector<16x1xf32> to vector<16x16xf32>
    %61 = arith.subf %57, %60 : vector<16x16xf32>
    %62 = math.exp %61 : vector<16x16xf32>
    %cst_28 = arith.constant dense<0.000000e+00> : vector<16xf32>
    %63 = vector.multi_reduction <add>, %62, %cst_28 [1] : vector<16x16xf32> to vector<16xf32>
    %64 = vector.shape_cast %63 : vector<16xf32> to vector<16x1xf32>
    %65 = tpu.reciprocal %64 : vector<16x1xf32> -> vector<16x1xf32>
    %66 = vector.broadcast %65 : vector<16x1xf32> to vector<16x16xf32>
    %67 = arith.mulf %62, %66 : vector<16x16xf32>
    %c0_29 = arith.constant 0 : index
    %c0_30 = arith.constant 0 : index
    %c1 = arith.constant 1 : index
    %c0_31 = arith.constant 0 : index
    %c0_32 = arith.constant 0 : index
    %68 = vector.load %arg11[%c0_29, %c0_30, %c1, %c0_31, %c0_32] : memref<2x1x2x16x16xf32, #tpu.memory_space<vmem>>, vector<1x1x1x16x16xf32>
    %69 = vector.shape_cast %68 : vector<1x1x1x16x16xf32> to vector<16x16xf32>
    %70 = vector.shape_cast %67 : vector<16x16xf32> to vector<1x1x1x16x16xf32>
    tpu.vector_store %arg11[%c0_29, %c0_30, %c1, %c0_31, %c0_32], %70 {strides = array<i32>} : memref<2x1x2x16x16xf32, #tpu.memory_space<vmem>>, vector<1x1x1x16x16xf32>,
    %71 = arith.truncf %67 : vector<16x16xf32> to vector<16x16xbf16>
    %cst_33 = arith.constant dense<0.000000e+00> : vector<16x128xf32>
    %72 = tpu.matmul %71, %52, %cst_33 {dimension_numbers = #tpu.dot_dimension_numbers<[1], [0], [0], [1], [0, 0, 1, 1], [], []>} : vector<16x16xbf16>, vector<16x128xbf16>, vector<16x128xf32> -> vector<16x128xf32>
    %c0_34 = arith.constant 0 : index
    %c128 = arith.constant 128 : index
    %73 = vector.load %arg13[%c0_34, %c128] : memref<32x256xf32, #tpu.memory_space<vmem>>, vector<16x128xf32>
    tpu.vector_store %arg13[%c0_34, %c128], %72 {strides = array<i32>} : memref<32x256xf32, #tpu.memory_space<vmem>>, vector<16x128xf32>,
    %74 = vector.extract_strided_slice %22 {offsets = [16, 0], sizes = [16, 128], strides = [1, 1]} : vector<32x768xbf16> to vector<16x128xbf16>
    %75 = vector.extract_strided_slice %22 {offsets = [16, 256], sizes = [16, 128], strides = [1, 1]} : vector<32x768xbf16> to vector<16x128xbf16>
    %76 = vector.extract_strided_slice %22 {offsets = [16, 512], sizes = [16, 128], strides = [1, 1]} : vector<32x768xbf16> to vector<16x128xbf16>
    %cst_35 = arith.constant dense<0.000000e+00> : vector<16x16xf32>
    %77 = tpu.matmul %74, %75, %cst_35 {dimension_numbers = #tpu.dot_dimension_numbers<[1], [1], [0], [0], [0, 0, 1, 0], [], []>} : vector<16x128xbf16>, vector<16x128xbf16>, vector<16x16xf32> -> vector<16x16xf32>
    %cst_36 = arith.constant 2.500000e-01 : f32
    %78 = vector.broadcast %cst_36 : f32 to vector<16x16xf32>
    %79 = arith.mulf %77, %78 : vector<16x16xf32>
    %cst_37 = arith.constant -1.000000e+30 : f32
    %80 = vector.broadcast %cst_37 : f32 to vector<16x16xf32>
    %81 = arith.select %25, %79, %80 : vector<16x16xi1>, vector<16x16xf32>
    %cst_38 = arith.constant dense<0xFF800000> : vector<16xf32>
    %82 = vector.multi_reduction <maximumf>, %81, %cst_38 [1] : vector<16x16xf32> to vector<16xf32>
    %83 = vector.shape_cast %82 : vector<16xf32> to vector<16x1xf32>
    %84 = vector.broadcast %83 : vector<16x1xf32> to vector<16x16xf32>
    %85 = arith.subf %81, %84 : vector<16x16xf32>
    %86 = math.exp %85 : vector<16x16xf32>
    %cst_39 = arith.constant dense<0.000000e+00> : vector<16xf32>
    %87 = vector.multi_reduction <add>, %86, %cst_39 [1] : vector<16x16xf32> to vector<16xf32>
    %88 = vector.shape_cast %87 : vector<16xf32> to vector<16x1xf32>
    %89 = tpu.reciprocal %88 : vector<16x1xf32> -> vector<16x1xf32>
    %90 = vector.broadcast %89 : vector<16x1xf32> to vector<16x16xf32>
    %91 = arith.mulf %86, %90 : vector<16x16xf32>
    %c1_40 = arith.constant 1 : index
    %c0_41 = arith.constant 0 : index
    %c0_42 = arith.constant 0 : index
    %c0_43 = arith.constant 0 : index
    %c0_44 = arith.constant 0 : index
    %92 = vector.load %arg11[%c1_40, %c0_41, %c0_42, %c0_43, %c0_44] : memref<2x1x2x16x16xf32, #tpu.memory_space<vmem>>, vector<1x1x1x16x16xf32>
    %93 = vector.shape_cast %92 : vector<1x1x1x16x16xf32> to vector<16x16xf32>
    %94 = vector.shape_cast %91 : vector<16x16xf32> to vector<1x1x1x16x16xf32>
    tpu.vector_store %arg11[%c1_40, %c0_41, %c0_42, %c0_43, %c0_44], %94 {strides = array<i32>} : memref<2x1x2x16x16xf32, #tpu.memory_space<vmem>>, vector<1x1x1x16x16xf32>,
    %95 = arith.truncf %91 : vector<16x16xf32> to vector<16x16xbf16>
    %cst_45 = arith.constant dense<0.000000e+00> : vector<16x128xf32>
    %96 = tpu.matmul %95, %76, %cst_45 {dimension_numbers = #tpu.dot_dimension_numbers<[1], [0], [0], [1], [0, 0, 1, 1], [], []>} : vector<16x16xbf16>, vector<16x128xbf16>, vector<16x128xf32> -> vector<16x128xf32>
    %c16 = arith.constant 16 : index
    %c0_46 = arith.constant 0 : index
    %97 = vector.load %arg13[%c16, %c0_46] : memref<32x256xf32, #tpu.memory_space<vmem>>, vector<16x128xf32>
    tpu.vector_store %arg13[%c16, %c0_46], %96 {strides = array<i32>} : memref<32x256xf32, #tpu.memory_space<vmem>>, vector<16x128xf32>,
    %98 = vector.extract_strided_slice %22 {offsets = [16, 128], sizes = [16, 128], strides = [1, 1]} : vector<32x768xbf16> to vector<16x128xbf16>
    %99 = vector.extract_strided_slice %22 {offsets = [16, 384], sizes = [16, 128], strides = [1, 1]} : vector<32x768xbf16> to vector<16x128xbf16>
    %100 = vector.extract_strided_slice %22 {offsets = [16, 640], sizes = [16, 128], strides = [1, 1]} : vector<32x768xbf16> to vector<16x128xbf16>
    %cst_47 = arith.constant dense<0.000000e+00> : vector<16x16xf32>
    %101 = tpu.matmul %98, %99, %cst_47 {dimension_numbers = #tpu.dot_dimension_numbers<[1], [1], [0], [0], [0, 0, 1, 0], [], []>} : vector<16x128xbf16>, vector<16x128xbf16>, vector<16x16xf32> -> vector<16x16xf32>
    %cst_48 = arith.constant 2.500000e-01 : f32
    %102 = vector.broadcast %cst_48 : f32 to vector<16x16xf32>
    %103 = arith.mulf %101, %102 : vector<16x16xf32>
    %cst_49 = arith.constant -1.000000e+30 : f32
    %104 = vector.broadcast %cst_49 : f32 to vector<16x16xf32>
    %105 = arith.select %25, %103, %104 : vector<16x16xi1>, vector<16x16xf32>
    %cst_50 = arith.constant dense<0xFF800000> : vector<16xf32>
    %106 = vector.multi_reduction <maximumf>, %105, %cst_50 [1] : vector<16x16xf32> to vector<16xf32>
    %107 = vector.shape_cast %106 : vector<16xf32> to vector<16x1xf32>
    %108 = vector.broadcast %107 : vector<16x1xf32> to vector<16x16xf32>
    %109 = arith.subf %105, %108 : vector<16x16xf32>
    %110 = math.exp %109 : vector<16x16xf32>
    %cst_51 = arith.constant dense<0.000000e+00> : vector<16xf32>
    %111 = vector.multi_reduction <add>, %110, %cst_51 [1] : vector<16x16xf32> to vector<16xf32>
    %112 = vector.shape_cast %111 : vector<16xf32> to vector<16x1xf32>
    %113 = tpu.reciprocal %112 : vector<16x1xf32> -> vector<16x1xf32>
    %114 = vector.broadcast %113 : vector<16x1xf32> to vector<16x16xf32>
    %115 = arith.mulf %110, %114 : vector<16x16xf32>
    %c1_52 = arith.constant 1 : index
    %c0_53 = arith.constant 0 : index
    %c1_54 = arith.constant 1 : index
    %c0_55 = arith.constant 0 : index
    %c0_56 = arith.constant 0 : index
    %116 = vector.load %arg11[%c1_52, %c0_53, %c1_54, %c0_55, %c0_56] : memref<2x1x2x16x16xf32, #tpu.memory_space<vmem>>, vector<1x1x1x16x16xf32>
    %117 = vector.shape_cast %116 : vector<1x1x1x16x16xf32> to vector<16x16xf32>
    %118 = vector.shape_cast %115 : vector<16x16xf32> to vector<1x1x1x16x16xf32>
    tpu.vector_store %arg11[%c1_52, %c0_53, %c1_54, %c0_55, %c0_56], %118 {strides = array<i32>} : memref<2x1x2x16x16xf32, #tpu.memory_space<vmem>>, vector<1x1x1x16x16xf32>,
    %119 = arith.truncf %115 : vector<16x16xf32> to vector<16x16xbf16>
    %cst_57 = arith.constant dense<0.000000e+00> : vector<16x128xf32>
    %120 = tpu.matmul %119, %100, %cst_57 {dimension_numbers = #tpu.dot_dimension_numbers<[1], [0], [0], [1], [0, 0, 1, 1], [], []>} : vector<16x16xbf16>, vector<16x128xbf16>, vector<16x128xf32> -> vector<16x128xf32>
    %c16_58 = arith.constant 16 : index
    %c128_59 = arith.constant 128 : index
    %121 = vector.load %arg13[%c16_58, %c128_59] : memref<32x256xf32, #tpu.memory_space<vmem>>, vector<16x128xf32>
    tpu.vector_store %arg13[%c16_58, %c128_59], %120 {strides = array<i32>} : memref<32x256xf32, #tpu.memory_space<vmem>>, vector<16x128xf32>,
    %c0_60 = arith.constant 0 : index
    %c0_61 = arith.constant 0 : index
    %122 = vector.load %arg13[%c0_60, %c0_61] : memref<32x256xf32, #tpu.memory_space<vmem>>, vector<32x256xf32>
    %123 = arith.truncf %122 : vector<32x256xf32> to vector<32x256xbf16>
    %c0_62 = arith.constant 0 : index
    %c0_63 = arith.constant 0 : index
    %c0_64 = arith.constant 0 : index
    %124 = vector.load %arg5[%c0_62, %c0_63, %c0_64] : memref<1x256x32xbf16, #tpu.memory_space<vmem>>, vector<1x256x32xbf16>
    %125 = vector.shape_cast %124 : vector<1x256x32xbf16> to vector<256x32xbf16>
    %cst_65 = arith.constant dense<0.000000e+00> : vector<32x32xf32>
    %126 = tpu.matmul %123, %125, %cst_65 {dimension_numbers = #tpu.dot_dimension_numbers<[1], [0], [0], [1], [0, 0, 1, 1], [], []>} : vector<32x256xbf16>, vector<256x32xbf16>, vector<32x32xf32> -> vector<32x32xf32>
    %127 = arith.addf %3, %126 : vector<32x32xf32>
    %c0_66 = arith.constant 0 : index
    %c0_67 = arith.constant 0 : index
    %c0_68 = arith.constant 0 : index
    %128 = vector.load %arg6[%c0_66, %c0_67, %c0_68] : memref<1x1x32xf32, #tpu.memory_space<vmem>>, vector<1x1x32xf32>
    %129 = vector.shape_cast %128 : vector<1x1x32xf32> to vector<1x32xf32>
    %130 = arith.mulf %127, %127 : vector<32x32xf32>
    %cst_69 = arith.constant dense<0.000000e+00> : vector<32xf32>
    %131 = vector.multi_reduction <add>, %130, %cst_69 [1] : vector<32x32xf32> to vector<32xf32>
    %132 = vector.shape_cast %131 : vector<32xf32> to vector<32x1xf32>
    %cst_70 = arith.constant 3.200000e+01 : f32
    %133 = vector.broadcast %cst_70 : f32 to vector<32x1xf32>
    %134 = arith.divf %132, %133 : vector<32x1xf32>
    %cst_71 = arith.constant 1.1920929E-7 : f32
    %135 = vector.broadcast %cst_71 : f32 to vector<32x1xf32>
    %136 = arith.addf %134, %135 : vector<32x1xf32>
    %137 = math.rsqrt %136 : vector<32x1xf32>
    %138 = vector.broadcast %137 : vector<32x1xf32> to vector<32x32xf32>
    %139 = arith.mulf %127, %138 : vector<32x32xf32>
    %140 = vector.broadcast %129 : vector<1x32xf32> to vector<32x32xf32>
    %141 = arith.mulf %139, %140 : vector<32x32xf32>
    %142 = arith.truncf %141 : vector<32x32xf32> to vector<32x32xbf16>
    %c0_72 = arith.constant 0 : index
    %c0_73 = arith.constant 0 : index
    %c0_74 = arith.constant 0 : index
    %143 = vector.load %arg7[%c0_72, %c0_73, %c0_74] : memref<1x32x256xbf16, #tpu.memory_space<vmem>>, vector<1x32x256xbf16>
    %144 = vector.shape_cast %143 : vector<1x32x256xbf16> to vector<32x256xbf16>
    %cst_75 = arith.constant dense<0.000000e+00> : vector<32x256xf32>
    %145 = tpu.matmul %142, %144, %cst_75 {dimension_numbers = #tpu.dot_dimension_numbers<[1], [0], [0], [1], [0, 0, 1, 1], [], []>} : vector<32x32xbf16>, vector<32x256xbf16>, vector<32x256xf32> -> vector<32x256xf32>
    %146 = vector.extract_strided_slice %145 {offsets = [0, 0], sizes = [32, 128], strides = [1, 1]} : vector<32x256xf32> to vector<32x128xf32>
    %147 = vector.extract_strided_slice %145 {offsets = [0, 128], sizes = [32, 128], strides = [1, 1]} : vector<32x256xf32> to vector<32x128xf32>
    %148 = arith.negf %146 : vector<32x128xf32>
    %149 = math.exp %148 : vector<32x128xf32>
    %cst_76 = arith.constant 1.000000e+00 : f32
    %150 = vector.broadcast %cst_76 : f32 to vector<32x128xf32>
    %151 = arith.addf %150, %149 : vector<32x128xf32>
    %152 = arith.divf %150, %151 : vector<32x128xf32>
    %153 = arith.mulf %146, %152 : vector<32x128xf32>
    %154 = arith.mulf %153, %147 : vector<32x128xf32>
    %155 = arith.truncf %154 : vector<32x128xf32> to vector<32x128xbf16>
    %c0_77 = arith.constant 0 : index
    %c0_78 = arith.constant 0 : index
    %c0_79 = arith.constant 0 : index
    %156 = vector.load %arg8[%c0_77, %c0_78, %c0_79] : memref<1x128x32xbf16, #tpu.memory_space<vmem>>, vector<1x128x32xbf16>
    %157 = vector.shape_cast %156 : vector<1x128x32xbf16> to vector<128x32xbf16>
    %cst_80 = arith.constant dense<0.000000e+00> : vector<32x32xf32>
    %158 = tpu.matmul %155, %157, %cst_80 {dimension_numbers = #tpu.dot_dimension_numbers<[1], [0], [0], [1], [0, 0, 1, 1], [], []>} : vector<32x128xbf16>, vector<128x32xbf16>, vector<32x32xf32> -> vector<32x32xf32>
    %159 = arith.addf %127, %158 : vector<32x32xf32>
    %c0_81 = arith.constant 0 : index
    %c0_82 = arith.constant 0 : index
    %160 = vector.load %arg12[%c0_81, %c0_82] : memref<32x32xf32, #tpu.memory_space<vmem>>, vector<32x32xf32>
    tpu.vector_store %arg12[%c0_81, %c0_82], %159 {strides = array<i32>} : memref<32x32xf32, #tpu.memory_space<vmem>>, vector<32x32xf32>,
    %c1_i32 = arith.constant 1 : i32
    %161 = arith.cmpi eq, %arg1, %c1_i32 : i32
    %162 = arith.extui %161 : i1 to i32
    %c0_i32_83 = arith.constant 0 : i32
    %163 = arith.cmpi ne, %162, %c0_i32_83 : i32
    scf.if %163 {
      %c0_84 = arith.constant 0 : index
      %c0_85 = arith.constant 0 : index
      %164 = vector.load %arg9[%c0_84, %c0_85] : memref<1x32xf32, #tpu.memory_space<vmem>>, vector<1x32xf32>
      %165 = arith.mulf %159, %159 : vector<32x32xf32>
      %cst_86 = arith.constant dense<0.000000e+00> : vector<32xf32>
      %166 = vector.multi_reduction <add>, %165, %cst_86 [1] : vector<32x32xf32> to vector<32xf32>
      %167 = vector.shape_cast %166 : vector<32xf32> to vector<32x1xf32>
      %cst_87 = arith.constant 3.200000e+01 : f32
      %168 = vector.broadcast %cst_87 : f32 to vector<32x1xf32>
      %169 = arith.divf %167, %168 : vector<32x1xf32>
      %cst_88 = arith.constant 1.1920929E-7 : f32
      %170 = vector.broadcast %cst_88 : f32 to vector<32x1xf32>
      %171 = arith.addf %169, %170 : vector<32x1xf32>
      %172 = math.rsqrt %171 : vector<32x1xf32>
      %173 = vector.broadcast %172 : vector<32x1xf32> to vector<32x32xf32>
      %174 = arith.mulf %159, %173 : vector<32x32xf32>
      %175 = vector.broadcast %164 : vector<1x32xf32> to vector<32x32xf32>
      %176 = arith.mulf %174, %175 : vector<32x32xf32>
      %177 = arith.truncf %176 : vector<32x32xf32> to vector<32x32xbf16>
      %178 = vector.shape_cast %177 : vector<32x32xbf16> to vector<2x16x32xbf16>
      %c0_89 = arith.constant 0 : index
      %c0_90 = arith.constant 0 : index
      %c0_91 = arith.constant 0 : index
      %179 = vector.load %arg10[%c0_89, %c0_90, %c0_91] : memref<2x16x32xbf16, #tpu.memory_space<vmem>>, vector<2x16x32xbf16>
      tpu.vector_store %arg10[%c0_89, %c0_90, %c0_91], %178 {strides = array<i32>} : memref<2x16x32xbf16, #tpu.memory_space<vmem>>, vector<2x16x32xbf16>,
    } else {
    }
    return
  }
  func.func @transform_0(%arg0: i32, %arg1: i32) -> (i32, i32, i32) {
    %c0_i32 = arith.constant 0 : i32
    %c0_i32_0 = arith.constant 0 : i32
    %c0_i32_1 = arith.constant 0 : i32
    return %arg0, %c0_i32, %c0_i32_0 : i32, i32, i32
  }
  func.func @transform_1(%arg0: i32, %arg1: i32) -> (i32, i32, i32) {
    %c0_i32 = arith.constant 0 : i32
    %c0_i32_0 = arith.constant 0 : i32
    %c0_i32_1 = arith.constant 0 : i32
    return %arg1, %c0_i32, %c0_i32_0 : i32, i32, i32
  }
  func.func @transform_2(%arg0: i32, %arg1: i32) -> (i32, i32, i32) {
    %c0_i32 = arith.constant 0 : i32
    %c0_i32_0 = arith.constant 0 : i32
    %c0_i32_1 = arith.constant 0 : i32
    return %arg1, %c0_i32, %c0_i32_0 : i32, i32, i32
  }
  func.func @transform_3(%arg0: i32, %arg1: i32) -> (i32, i32, i32) {
    %c0_i32 = arith.constant 0 : i32
    %c0_i32_0 = arith.constant 0 : i32
    %c0_i32_1 = arith.constant 0 : i32
    return %arg1, %c0_i32, %c0_i32_0 : i32, i32, i32
  }
  func.func @transform_4(%arg0: i32, %arg1: i32) -> (i32, i32, i32) {
    %c0_i32 = arith.constant 0 : i32
    %c0_i32_0 = arith.constant 0 : i32
    %c0_i32_1 = arith.constant 0 : i32
    return %arg1, %c0_i32, %c0_i32_0 : i32, i32, i32
  }
  func.func @transform_5(%arg0: i32, %arg1: i32) -> (i32, i32, i32) {
    %c0_i32 = arith.constant 0 : i32
    %c0_i32_0 = arith.constant 0 : i32
    %c0_i32_1 = arith.constant 0 : i32
    return %arg1, %c0_i32, %c0_i32_0 : i32, i32, i32
  }
  func.func @transform_6(%arg0: i32, %arg1: i32) -> (i32, i32, i32) {
    %c0_i32 = arith.constant 0 : i32
    %c0_i32_0 = arith.constant 0 : i32
    %c0_i32_1 = arith.constant 0 : i32
    return %arg1, %c0_i32, %c0_i32_0 : i32, i32, i32
  }
  func.func @transform_7(%arg0: i32, %arg1: i32) -> (i32, i32) {
    %c0_i32 = arith.constant 0 : i32
    %c0_i32_0 = arith.constant 0 : i32
    %c0_i32_1 = arith.constant 0 : i32
    return %c0_i32, %c0_i32_0 : i32, i32
  }
  func.func @transform_8(%arg0: i32, %arg1: i32) -> (i32, i32, i32) {
    %c0_i32 = arith.constant 0 : i32
    %c0_i32_0 = arith.constant 0 : i32
    %c0_i32_1 = arith.constant 0 : i32
    return %arg0, %c0_i32, %c0_i32_0 : i32, i32, i32
  }
  func.func @transform_9(%arg0: i32, %arg1: i32) -> (i32, i32, i32, i32, i32) {
    %c0_i32 = arith.constant 0 : i32
    %c0_i32_0 = arith.constant 0 : i32
    %c0_i32_1 = arith.constant 0 : i32
    %c0_i32_2 = arith.constant 0 : i32
    return %arg0, %arg1, %c0_i32, %c0_i32_0, %c0_i32_1 : i32, i32, i32, i32, i32
  }
}

</mosaic_0001>

<bundles_post_ra>
// kernel: tpu_custom_call.1
= control target key start
LH: loop header
LB: loop body
LE: loop exit
PB: predicated region body
PF: predicated region fallthrough
CT: control target
= control target key end

     0   :  { %s3026_s0 = inlined_call_operand.vmem [shape: f32[2,16,32], index: 0, kind: input, shape index: {}]   ;;  %s3027_s1 = inlined_call_operand.vmem [shape: f32[2,1,32], index: 1, kind: input, shape index: {}]   ;;  %s3028_s2 = inlined_call_operand.vmem [shape: bf16[2,32,768], index: 2, kind: input, shape index: {}]   ;;  %s3029_s3 = inlined_call_operand.vmem [shape: bf16[2,256,32], index: 3, kind: input, shape index: {}]   ;;  %s3030_s4 = inlined_call_operand.vmem [shape: f32[2,1,32], index: 4, kind: input, shape index: {}]   ;;  %s3031_s5 = inlined_call_operand.vmem [shape: bf16[2,32,256], index: 5, kind: input, shape index: {}]   ;;  %s3032_s6 = inlined_call_operand.vmem [shape: bf16[2,128,32], index: 6, kind: input, shape index: {}]   ;;  %s3033_s7 = inlined_call_operand.vmem [shape: f32[1,32], index: 7, kind: input, shape index: {}]   ;;  %s3034_s8 = inlined_call_operand.hbm [shape: bf16[2,16,32], index: 8, kind: output, shape index: {0}]   ;;  %s3035_s9 = inlined_call_operand.hbm [shape: f32[2,2,2,16,16], index: 9, kind: output, shape index: {1}]  }
   0x1   :  { %3046 = sst [smem:[#allocation20_spill]] %s3035_s9 }
   0x2   :  { %15 = vsyncpa [#allocation5], 0 }
   0x3   :  { %16 = vsyncpa [#allocation7], 0 }
   0x4   :  { %18 = vsyncpa [#allocation7 + $0x1], 0  ;;  %s2585_s30 = smov 0   ;;  %s2587_s10 = smov 0  }
   0x5   :  { %s2589_s11 = smov 0   ;;  %s2591_s12 = smov 0  }
   0x6   :  { %s2593_s13 = smov 0   ;;  %s2595_s14 = smov 0  }
   0x7 LB: > { %3047 = sst [smem:[#allocation12_spill]] %s2500_s30  ;;  %s2017_s15 = sadd.s32 4294967295, %s2520_s14   ;;  %s2520_s14 = sphi %s2595_s14, %s24_s14   ;;  %s2516_s13 = sphi %s2593_s13, %s3068_s13   ;;  %s2512_s12 = sphi %s2591_s12, %s3067_s12   ;;  %s2508_s11 = sphi %s2589_s11, %s3066_s11   ;;  %s2504_s10 = sphi %s2587_s10, %s3070_s10   ;;  %s2500_s30 = sphi %s2585_s30, %s3069_s30  }
   0x8   : > { %3048 = sst [smem:[#allocation13_spill]] %s2508_s11  ;;  %s2018_s16 = sadd.s32 4294967294, %s2520_s14  }
   0x9   : > { %3049 = sst [smem:[#allocation14_spill]] %s2516_s13  ;;  %s33_s17 = sadd.s32 1, %s2516_s13 }
   0xa   : > { %3050 = sst [smem:[#allocation15_spill]] %s2520_s14  ;;  %s274_s18 = sadd.s32 1, %s2508_s11 }
   0xb   : > { %p34_p0 = scmp.ge.s32.totalorder %s33_s17, 2  ;;  %p284_p1 = scmp.ne.s32.totalorder %s2508_s11, %s2504_s10 }
   0xc   : > { %p2621_p2 = scmp.eq.s32.totalorder %s2017_s15, 1  ;;  %p290_p3 = scmp.ne.s32.totalorder %s2504_s10, %s2500_s30 }
   0xd   : > { %s3072_s17 = smov (%p34_p0, %s33_s17), 0  ;;  %p291_p5 = scmp.eq.s32.totalorder %s2018_s16, 1 }
   0xe   : > { %3052 = sst [smem:[#allocation16_spill]] %s3072_s17  ;;  %p2631_p4 = por %p2621_p2, %p284_p1 }
   0xf   : > { %s270_s21 = ssub.s32 %s2516_s13, %s3072_s17  ;;  %p2022_p6 = scmp.ge.s32.totalorder %s2520_s14, 1 }
  0x10   : > { %s3053_s20 = scalar_select %p2631_p4, 1, 0 }
  0x11   : > { %p272_p7 = scmp.eq.s32.totalorder %s270_s21, 0  ;;  %p2638_p8 = por %p291_p5, %p290_p3 }
  0x12   : > { %3054 = sst [smem:[#allocation17_spill]] %s3053_s20  ;;  %p366_p9 = scmp.lt.s32.totalorder %s2520_s14, 3 }
  0x13   : > { %s3055_s22 = scalar_select %p2638_p8, 1, 0 }
  0x14   : > { %s2644_s23 = scalar_select %p272_p7, %s2508_s11, %s274_s18  }
  0x15   : > { %3056 = sst [smem:[#allocation18_spill]] %s3055_s22  ;;  %p367_p10 = pnand %p2022_p6, %p366_p9 }
  0x16   : > { %3057 = sst [smem:[#allocation19_spill]] %s2644_s23  ;;  %s3038_s24 = sand.u32 (!%p367_p10), 1, %s2504_s10  }
  0x17   : > { %370 = sbr.rel (%p367_p10) target bundleno = 2262 (0x8d6), region = 52  ;;  %p436_p11 = scmp.lt.s32.totalorder (!%p367_p10), %s2512_s12, 1 }
  0x18   : > { %s2023_s25 = sshll.u32 (!%p367_p10), %s3038_s24, 6  ;;  %p2031_p12 = scmp.ne.s32.totalorder (!%p367_p10), %s2512_s12, 0 }
  0x19   : > { %s2685_s13 = scalar_lea.vmem (!%p367_p10), [#allocation6], %s2023_s25 }
  0x1e   : > { %s2651_s26 = scalar_select %p436_p11, %s2512_s12, 1 }
  0x1f   : > { %468 = sbr.rel (%p2031_p12) target bundleno = 38 (0x26), region = 56  ;;  %v469_v0 = vld [vmem:[%s3026_s0] sm:$0xff] (!%p2031_p12)  ;;  %vm473_vm0 = vcmask (!%p2031_p12), 261120   ;;  %v470_v1 = vld [vmem:[%s3026_s0 + $0x8] sm:$0xff] (!%p2031_p12)  ;;  %v471_v2 = vld [vmem:[%s3026_s0 + $0x10] sm:$0xff] (!%p2031_p12) }
  0x20   : > { %s2239_s15 = smul.u32 96, %s2651_s26  ;;  %s2109_s16 = sshll.u32 %s2651_s26, 7  ;;  %474 = vst.msk [vmem:[#allocation2] sm:$0xff] (!%p2031_p12), %vm473_vm0, %v469_v0  ;;  %475 = vst.msk [vmem:[#allocation2 + $0x8] sm:$0xff] (!%p2031_p12), %vm473_vm0, %v470_v1  ;;  %v472_v3 = vld [vmem:[%s3026_s0 + $0x18] sm:$0xff] (!%p2031_p12) }
  0x21   : > { %s451_s17 = scalar_lea.vmem %s3030_s4, %s2651_s26  ;;  %s2671_s27 = scalar_lea.vmem %s3029_s3, %s2109_s16  ;;  %476 = vst.msk [vmem:[#allocation2 + $0x10] sm:$0xff] (!%p2031_p12), %vm473_vm0, %v471_v2  ;;  %477 = vst.msk [vmem:[#allocation2 + $0x18] sm:$0xff] (!%p2031_p12), %vm473_vm0, %v472_v3 }
  0x22   : > { %s2666_s23 = scalar_lea.vmem %s3028_s2, %s2239_s15  ;;  %s2110_s28 = sshll.u32 %s2651_s26, 5 }
  0x23   : > { %s2111_s30 = sshll.u32 %s2651_s26, 6  ;;  %s2678_s9 = scalar_lea.vmem %s3031_s5, %s2110_s28 }
  0x24   : > { %s2683_s21 = scalar_lea.vmem %s3032_s6, %s2111_s30 }
  0x26 PF: > { %vm487_vm1 = vcmask 261120   ;;  %v2320_v16 = vld [vmem:[%s2666_s23 + $0x4] ss:$24 sps:$4 sm:$0xff]   ;;  %v2324_v18 = vld [vmem:[%s2666_s23] ss:$24 sps:$4 sm:$0xff]   ;;  %v2522_v24 = vmov 0   ;;  %s3058_s28 = scalar_lea.vmem %s3027_s1, %s2651_s26 }
  0x27   : > { %v2700_v4 = vld [vmem:[#allocation2] sm:$0xff]  ;;  %v2702_v5 = vld [vmem:[#allocation2 + $0x8] sm:$0xff]  ;;  %v2328_v21 = vld [vmem:[%s2666_s23 + $0x3c] ss:$24 sps:$4 sm:$0xff]   ;;  %607 = vmatprep.subr.bf16.mxu0 %v2320_v16  ;;  %639 = vmatprep.mubr.bf16.mxu0 %v2522_v24  ;;  %v2523_v56 = vmov 0.0   ;;  %vm2524_vm2 = vmmov 0  }
  0x28   : > { %v2704_v6 = vld [vmem:[#allocation2 + $0x10] sm:$0xff]  ;;  %v483_v7 = vmul.f32 %v2700_v4, %v2700_v4  ;;  %v484_v8 = vmul.f32 %v2702_v5, %v2702_v5  ;;  %v2712_v10 = vld [vmem:[#allocation2 + $0x18] sm:$0xff]  ;;  %v2322_v17 = vld [vmem:[%s2666_s23 + $0xc] ss:$24 sps:$4 sm:$0xff]   ;;  %608 = vmatpush1.bf16.msra.mxu0 %v2324_v18  ;;  %692 = vmatprep.mubr.bf16.mxu1 %v2522_v24  ;;  %vm830_vm4 = vcmask 130048   ;;  %p2096_p13 = scmp.ne.s32.totalorder %s2512_s12, 1 }
  0x29   : > { %v485_v9 = vmul.f32 %v2704_v6, %v2704_v6  ;;  %v486_v11 = vmul.f32 %v2712_v10, %v2712_v10  ;;  %v2325_v19 = vld [vmem:[%s2666_s23 + $0x8] ss:$24 sps:$4 sm:$0xff]   ;;  %v2326_v20 = vld [vmem:[%s2666_s23 + $0x34] ss:$24 sps:$4 sm:$0xff]   ;;  %660 = vmatprep.subr.bf16.mxu1 %v2322_v17  ;;  %v2331_v23 = vld [vmem:[%s2666_s23 + $0x38] ss:$24 sps:$4 sm:$0xff]  }
  0x2a   : > { %v488_v12 = vsel %vm487_vm1, %v483_v7, 0.0  ;;  %v491_v14 = vsel %vm487_vm1, %v484_v8, 0.0  ;;  %661 = vmatpush1.bf16.msra.mxu1 %v2325_v19  ;;  %v2330_v22 = vld [vmem:[%s2666_s23 + $0x30] ss:$24 sps:$4 sm:$0xff]   ;;  %609 = vmatprep.subr.bf16.mxu0 %v2326_v20  ;;  %v2334_v25 = vld [vmem:[%s2666_s23 + $0x14] ss:$24 sps:$4 sm:$0xff]  }
  0x2b   : > { %v494_v13 = vsel %vm487_vm1, %v485_v9, 0.0  ;;  %489 = vadd.xlane.f32.xlu0 %v488_v12  ;;  %v497_v15 = vsel %vm487_vm1, %v486_v11, 0.0  ;;  %662 = vmatprep.subr.bf16.mxu1 %v2328_v21  ;;  %v2032_v42 = vld [vmem:[%s3058_s28] ss:$0 sm:$0xff]  ;;  %v2332_v50 = vld [vmem:[%s2666_s23 + $0x10] ss:$24 sps:$4 sm:$0xff]  }
  0x2c   : > { %495 = vadd.xlane.f32.xlu1 %v494_v13  ;;  %610 = vmatpush1.bf16.msra.mxu0 %v2330_v22  ;;  %v2337_v51 = vld [vmem:[%s2666_s23 + $0x44] ss:$24 sps:$4 sm:$0xff]   ;;  %v2335_v54 = vld [vmem:[%s2666_s23 + $0x40] ss:$24 sps:$4 sm:$0xff]   ;;  %vm1792_vm6 = vcmask (!%p2096_p13), 257024  }
  0x2d   : > { %713 = vmatprep.subr.bf16.mxu0 %v2334_v25 }
  0x2e   : > { %663 = vmatpush1.bf16.msra.mxu1 %v2331_v23 }
  0x2f   : > { %492 = vadd.xlane.f32.xlu0 %v491_v14  ;;  %2171 = vmatprep.subr.bf16.mxu1 %v2523_v56 }
  0x30   : > { %498 = vadd.xlane.f32.xlu1 %v497_v15 }
  0xb8   : > { %v490_v26 = vpop.xlane.xlu0 %489 }
  0xb9   : > { %v496_v27 = vpop.xlane.xlu1 %495  ;;  %v501_v28 = vmul.f32 0.03125, %v490_v26 }
  0xba   : > { %v503_v29 = vmul.f32 0.03125, %v496_v27 }
  0xbb   : > { %v505_v30 = vadd.f32 1.1920929e-07, %v501_v28 }
  0xbc   : > { %v493_v31 = vpop.xlane.xlu0 %492  ;;  %v507_v32 = vadd.f32 1.1920929e-07, %v503_v29 }
  0xbd   : > { %v499_v33 = vpop.xlane.xlu1 %498  ;;  %2368 = vrsqrt.f32 %v505_v30  ;;  %v502_v34 = vmul.f32 0.03125, %v493_v31 }
  0xbe   : > { %v504_v35 = vmul.f32 0.03125, %v499_v33  ;;  %2370 = vrsqrt.f32 %v507_v32 }
  0xbf   : > { %v506_v36 = vadd.f32 1.1920929e-07, %v502_v34  ;;  %v778_v34 = vlaneseq }
  0xc0   : > { %v508_v37 = vadd.f32 1.1920929e-07, %v504_v35 }
  0xc1   : > { %2372 = vrsqrt.f32 %v506_v36  ;;  %v779_v35 = vshrl.u32 %v778_v34, 7  ;;  %v782_v36 = vand.u32 127, %v778_v34 }
  0xc2   : > { %2374 = vrsqrt.f32 %v508_v37 }
  0xc3   : > { %v780_v37 = vadd.s32 8, %v779_v35  ;;  %vm783_vm3 = vcmp.ge.s32.totalorder %v779_v35, %v782_v36 }
  0xc5   : > { %vm784_vm5 = vcmp.ge.s32.totalorder %v780_v37, %v782_v36 }
  0xc7   : > { %v2369_v38 = vpop.eup %2368 }
  0xc8   : > { %v2371_v39 = vpop.eup %2370  ;;  %v513_v40 = vmul.f32 %v2369_v38, %v2700_v4 }
  0xc9   : > { %v515_v47 = vmul.f32 %v2371_v39, %v2704_v6 }
  0xca   : > { %v523_v45 = vmul.f32 %v2032_v42, %v513_v40 }
  0xcb   : > { %v2373_v41 = vpop.eup %2372  ;;  %v525_v52 = vmul.f32 %v2032_v42, %v515_v47 }
  0xcc   : > { %v2375_v43 = vpop.eup %2374  ;;  %v514_v44 = vmul.f32 %v2373_v41, %v2702_v5 }
  0xcd   : > { %v516_v48 = vmul.f32 %v2375_v43, %v2712_v10 }
  0xce   : > { %v524_v46 = vmul.f32 %v2032_v42, %v514_v44 }
  0xcf   : > { %v526_v53 = vmul.f32 %v2032_v42, %v516_v48 }
  0xd0   : > { %v527_v49 = vpack.c.bf16 %v524_v46, %v523_v45 }
  0xd1   : > { %v528_v55 = vpack.c.bf16 %v526_v53, %v525_v52 }
  0xd2   : > { %2045 = vmatmul.mubr.msk.bf16.vlgmr.msra.gmra.mrb[0].mxu0 %vm487_vm1, %v527_v49  ;;  %2047 = vmatmul.mubr.msk.bf16.vlgmr.msra.gmra.mrb[0].mxu1 %vm487_vm1, %v527_v49 }
  0xd3   : > { %649 = vmatprep.mubr.bf16.mxu0 %v2522_v24  ;;  %702 = vmatprep.mubr.bf16.mxu1 %v2522_v24 }
  0xd4   : > { %714 = vmatpush1.bf16.msra.mxu0 %v2332_v50 }
  0xd5   : > { %715 = vmatprep.subr.bf16.mxu0 %v2337_v51 }
  0xd8   : > { %716 = vmatpush1.bf16.msra.mxu0 %v2335_v54 }
  0xd9   : > { %2183 = vmatprep.subr.bf16.mxu0 %v2523_v56 }
  0xda   : > { %2046 = vmatmul.mubr.msk.bf16.gmra.mrb[4].mxu0 %vm487_vm1, %v528_v55  ;;  %2048 = vmatmul.mubr.msk.bf16.gmra.mrb[4].mxu1 %vm487_vm1, %v528_v55 }
  0xdb   : > { %745 = vmatprep.mubr.bf16.mxu0 %v2522_v24  ;;  %2173 = vmatprep.mubr.msk.bf16.mxu1 %vm2524_vm2, %v2523_v56 }
  0xe2   : > { %2049 = vmatmul.mubr.msk.bf16.vlgmr.msra.gmra.mrb[8].mxu0 %vm487_vm1, %v527_v49 }
  0xe3   : > { %755 = vmatprep.mubr.bf16.mxu0 %v2522_v24 }
  0xea   : > { %2050 = vmatmul.mubr.msk.bf16.gmra.mrb[12].mxu0 %vm487_vm1, %v528_v55 }
  0xeb   : > { %2185 = vmatprep.mubr.msk.bf16.mxu0 %vm2524_vm2, %v2523_v56 }
 0x1a5   : > { %v641_v57 = vpop.f32.mrb[0].mxu0  ;;  %v694_v58 = vpop.f32.mrb[0].mxu1 }
 0x1a6   : > { %v643_v59 = vpop.f32.mrb[1].mxu0  ;;  %v696_v60 = vpop.f32.mrb[1].mxu1 }
 0x1a7   : > { %v645_v61 = vpop.f32.mrb[2].mxu0  ;;  %v698_v62 = vpop.f32.mrb[2].mxu1 }
 0x1a8   : > { %v766_v63 = vpack.c.bf16 %v645_v61, %v641_v57  ;;  %v768_v0 = vpack.c.bf16 %v698_v62, %v694_v58  ;;  %v647_v1 = vpop.f32.mrb[3].mxu0  ;;  %v700_v2 = vpop.f32.mrb[3].mxu1 }
 0x1a9   : > { %v767_v3 = vpack.c.bf16 %v647_v1, %v643_v59  ;;  %v769_v7 = vpack.c.bf16 %v700_v2, %v696_v60 }
 0x1aa   : > { %2172 = vmatpush3.bf16.xpose.msra.mxu1 %v768_v0 }
 0x1ab   : > { %2184 = vmatpush3.bf16.xpose.msra.mxu0 %v769_v7  ;;  %2177 = vmatprep.subr.bf16.mxu1 %v2523_v56 }
 0x1ac   : > { %2195 = vmatprep.subr.bf16.mxu0 %v2523_v56 }
 0x1ad   : > { %v704_v8 = vpop.f32.mrb[4].mxu1  ;;  %v651_v9 = vpop.f32.mrb[4].mxu0 }
 0x1ae   : > { %v706_v11 = vpop.f32.mrb[5].mxu1  ;;  %v653_v12 = vpop.f32.mrb[5].mxu0 }
 0x1af   : > { %v708_v13 = vpop.f32.mrb[6].mxu1  ;;  %v655_v14 = vpop.f32.mrb[6].mxu0 }
 0x1b0   : > { %v774_v15 = vpack.c.bf16 %v708_v13, %v704_v8  ;;  %v772_v16 = vpack.c.bf16 %v655_v14, %v651_v9  ;;  %v657_v17 = vpop.f32.mrb[7].mxu0  ;;  %v710_v18 = vpop.f32.mrb[7].mxu1 }
 0x1b1   : > { %2174 = vmatmul.mubr.bf16.vlgmr.msra.gmra.mrb[8].mxu1 %v766_v63  ;;  %v773_v19 = vpack.c.bf16 %v657_v17, %v653_v12  ;;  %v775_v20 = vpack.c.bf16 %v710_v18, %v706_v11 }
 0x1b2   : > { %2186 = vmatmul.mubr.bf16.vlgmr.msra.gmra.mrb[16].mxu0 %v767_v3  ;;  %2179 = vmatprep.mubr.msk.bf16.mxu1 %vm2524_vm2, %v2523_v56 }
 0x1b3   : > { %2196 = vmatpush3.bf16.xpose.msra.mxu0 %v774_v15  ;;  %2197 = vmatprep.mubr.msk.bf16.mxu0 %vm2524_vm2, %v2523_v56 }
 0x1b4   : > { %2207 = vmatprep.subr.bf16.mxu0 %v2523_v56 }
 0x1b5   : > { %v747_v21 = vpop.f32.mrb[8].mxu0 }
 0x1b6   : > { %v2766_v22 = vpop.f32.mrb[9].mxu0 }
 0x1b7   : > { %v751_v23 = vpop.f32.mrb[10].mxu0 }
 0x1b8   : > { %v770_v25 = vpack.c.bf16 %v751_v23, %v747_v21  ;;  %v2768_v26 = vpop.f32.mrb[11].mxu0 }
 0x1b9   : > { %v771_v27 = vpack.c.bf16 %v2768_v26, %v2766_v22 }
 0x1ba   : > { %2178 = vmatpush3.bf16.msra.mxu1 %v770_v25  ;;  %2198 = vmatmul.mubr.bf16.vlgmr.msra.gmra.mrb[20].mxu0 %v772_v16 }
 0x1bb   : > { %2208 = vmatpush3.bf16.xpose.msra.mxu0 %v775_v20  ;;  %2209 = vmatprep.mubr.msk.bf16.mxu0 %vm2524_vm2, %v2523_v56 }
 0x1bc   : > { %2189 = vmatprep.subr.bf16.mxu1 %v2523_v56 }
 0x1bd   : > { %v2775_v28 = vpop.f32.mrb[12].mxu0 }
 0x1be   : > { %v2777_v29 = vpop.f32.mrb[13].mxu0 }
 0x1bf   : > { %v2779_v30 = vpop.f32.mrb[14].mxu0 }
 0x1c0   : > { %v776_v31 = vpack.c.bf16 %v2779_v30, %v2775_v28  ;;  %v2783_v32 = vpop.f32.mrb[15].mxu0  ;;  %v2348_v30 = vld [vmem:[%s2671_s27 + $0x68] sm:$0xff]  }
 0x1c1   : > { %v777_v33 = vpack.c.bf16 %v2783_v32, %v2777_v29 }
 0x1c2   : > { %2210 = vmatmul.mubr.bf16.vlgmr.msra.gmra.mrb[24].mxu0 %v773_v19 }
 0x284   : > { %v819_v38 = vpop.f32.mrb[8].mxu1 }
 0x285   : > { %v826_v39 = vmul.f32 0.25, %v819_v38  ;;  %v2175_v40 = vpop.f32.mrb[9].mxu1  ;;  %v936_v41 = vpop.f32.mrb[16].mxu0 }
 0x286   : > { %v943_v42 = vmul.f32 0.25, %v936_v41  ;;  %v822_v43 = vpop.f32.mrb[10].mxu1  ;;  %v2187_v44 = vpop.f32.mrb[17].mxu0 }
 0x287   : > { %v827_v45 = vmul.f32 0.25, %v822_v43  ;;  %v2176_v46 = vpop.f32.mrb[11].mxu1  ;;  %v939_v47 = vpop.f32.mrb[18].mxu0  ;;  %v828_v48 = vsel %vm783_vm3, %v826_v39, -1e+30 }
 0x288   : > { %v944_v49 = vmul.f32 0.25, %v939_v47  ;;  %v2188_v50 = vpop.f32.mrb[19].mxu0  ;;  %v831_v51 = vsel %vm830_vm4, %v828_v48, -inf  ;;  %v945_v53 = vsel %vm783_vm3, %v943_v42, -1e+30 }
 0x289   : > { %832 = vmax.xlane.f32.xlu0 %v831_v51  ;;  %v829_v52 = vsel %vm784_vm5, %v827_v45, -1e+30  ;;  %v947_v57 = vsel %vm830_vm4, %v945_v53, -inf }
 0x28a   : > { %v834_v54 = vsel %vm830_vm4, %v829_v52, -inf  ;;  %v946_v55 = vsel %vm784_vm5, %v944_v49, -1e+30 }
 0x28b   : > { %835 = vmax.xlane.f32.xlu1 %v834_v54  ;;  %v950_v61 = vsel %vm830_vm4, %v946_v55, -inf }
 0x28d   : > { %948 = vmax.xlane.f32.xlu0 %v947_v57  ;;  %v1053_v58 = vpop.f32.mrb[20].mxu0 }
 0x28e   : > { %v1060_v59 = vmul.f32 0.25, %v1053_v58  ;;  %v2199_v60 = vpop.f32.mrb[21].mxu0 }
 0x28f   : > { %951 = vmax.xlane.f32.xlu1 %v950_v61  ;;  %v1056_v62 = vpop.f32.mrb[22].mxu0 }
 0x290   : > { %v1061_v63 = vmul.f32 0.25, %v1056_v62  ;;  %v2200_v0 = vpop.f32.mrb[23].mxu0  ;;  %v1062_v1 = vsel %vm783_vm3, %v1060_v59, -1e+30 }
 0x291   : > { %v1064_v2 = vsel %vm830_vm4, %v1062_v1, -inf }
 0x292   : > { %1065 = vmax.xlane.f32.xlu0 %v1064_v2  ;;  %v1063_v3 = vsel %vm784_vm5, %v1061_v63, -1e+30 }
 0x293   : > { %v1067_v7 = vsel %vm830_vm4, %v1063_v3, -inf }
 0x294   : > { %1068 = vmax.xlane.f32.xlu1 %v1067_v7 }
 0x295   : > { %v1170_v8 = vpop.f32.mrb[24].mxu0 }
 0x296   : > { %v1177_v9 = vmul.f32 0.25, %v1170_v8  ;;  %v2211_v11 = vpop.f32.mrb[25].mxu0 }
 0x297   : > { %v1173_v12 = vpop.f32.mrb[26].mxu0  ;;  %v2339_v11 = vld [vmem:[%s2671_s27] sm:$0xff]  }
 0x298   : > { %v1178_v13 = vmul.f32 0.25, %v1173_v12  ;;  %v2212_v14 = vpop.f32.mrb[27].mxu0  ;;  %v1179_v15 = vsel %vm783_vm3, %v1177_v9, -1e+30  ;;  %v2338_v9 = vld [vmem:[%s2671_s27 + $0x40] sm:$0xff]   ;;  %v2340_v12 = vld [vmem:[%s2671_s27 + $0x48] sm:$0xff]  }
 0x299   : > { %v1181_v16 = vsel %vm830_vm4, %v1179_v15, -inf  ;;  %2133 = vmatprep.subr.bf16.mxu0 %v2338_v9  ;;  %v2342_v14 = vld [vmem:[%s2671_s27 + $0x50] sm:$0xff]  }
 0x29a   : > { %1182 = vmax.xlane.f32.xlu0 %v1181_v16  ;;  %v1180_v17 = vsel %vm784_vm5, %v1178_v13, -1e+30  ;;  %2134 = vmatpush3.bf16.msra.mxu0 %v2339_v11  ;;  %v2341_v13 = vld [vmem:[%s2671_s27 + $0x8] sm:$0xff]   ;;  %v2344_v16 = vld [vmem:[%s2671_s27 + $0x58] sm:$0xff]  }
 0x29b   : > { %v1184_v18 = vsel %vm830_vm4, %v1180_v17, -inf  ;;  %2135 = vmatprep.subr.bf16.mxu0 %v2340_v12 }
 0x29c   : > { %1185 = vmax.xlane.f32.xlu1 %v1184_v18  ;;  %v2346_v18 = vld [vmem:[%s2671_s27 + $0x60] sm:$0xff]  }
 0x29e   : > { %2136 = vmatpush3.bf16.msra.mxu0 %v2341_v13 }
 0x29f   : > { %2137 = vmatprep.subr.bf16.mxu0 %v2342_v14 }
 0x316   : > { %v833_v19 = vpop.xlane.xlu0 %832 }
 0x317   : > { %v837_v20 = vsub.f32 %v828_v48, %v833_v19  ;;  %v2347_v19 = vld [vmem:[%s2671_s27 + $0x20] sm:$0xff]  }
 0x318   : > { %v836_v21 = vpop.xlane.xlu1 %835 }
 0x319   : > { %v839_v23 = vmul.f32 1.442695, %v837_v20  ;;  %v838_v25 = vsub.f32 %v829_v52, %v836_v21 }
 0x31a   : > { %v949_v34 = vpop.xlane.xlu0 %948 }
 0x31b   : > { %2376 = vpow2.f32 %v839_v23  ;;  %v841_v38 = vmul.f32 1.442695, %v838_v25  ;;  %v953_v39 = vsub.f32 %v945_v53, %v949_v34 }
 0x31c   : > { %v952_v40 = vpop.xlane.xlu1 %951 }
 0x31d   : > { %2378 = vpow2.f32 %v841_v38  ;;  %v955_v35 = vmul.f32 1.442695, %v953_v39  ;;  %v954_v41 = vsub.f32 %v946_v55, %v952_v40 }
 0x31f   : > { %2380 = vpow2.f32 %v955_v35  ;;  %v957_v42 = vmul.f32 1.442695, %v954_v41  ;;  %v1066_v36 = vpop.xlane.xlu0 %1065 }
 0x320   : > { %v1070_v37 = vsub.f32 %v1062_v1, %v1066_v36 }
 0x321   : > { %2382 = vpow2.f32 %v957_v42  ;;  %v1069_v43 = vpop.xlane.xlu1 %1068 }
 0x322   : > { %v1072_v44 = vmul.f32 1.442695, %v1070_v37  ;;  %v1071_v45 = vsub.f32 %v1063_v3, %v1069_v43 }
 0x324   : > { %2384 = vpow2.f32 %v1072_v44  ;;  %v1074_v46 = vmul.f32 1.442695, %v1071_v45 }
 0x325   : > { %v2803_v47 = vpop.eup %2376 }
 0x326   : > { %2386 = vpow2.f32 %v1074_v46  ;;  %v843_v48 = vsel %vm830_vm4, %v2803_v47, 0.0 }
 0x327   : > { %v2807_v49 = vpop.eup %2378  ;;  %844 = vadd.xlane.f32.xlu0 %v843_v48  ;;  %v1183_v50 = vpop.xlane.xlu0 %1182 }
 0x328   : > { %v1187_v51 = vsub.f32 %v1179_v15, %v1183_v50  ;;  %v846_v52 = vsel %vm830_vm4, %v2807_v49, 0.0  ;;  %v2343_v15 = vld [vmem:[%s2671_s27 + $0x10] sm:$0xff]  }
 0x329   : > { %v2811_v53 = vpop.eup %2380  ;;  %847 = vadd.xlane.f32.xlu1 %v846_v52  ;;  %v1186_v54 = vpop.xlane.xlu1 %1185  ;;  %2138 = vmatpush3.bf16.msra.mxu0 %v2343_v15 }
 0x32a   : > { %v1189_v55 = vmul.f32 1.442695, %v1187_v51  ;;  %v1188_v57 = vsub.f32 %v1180_v17, %v1186_v54  ;;  %v959_v58 = vsel %vm830_vm4, %v2811_v53, 0.0  ;;  %v2345_v17 = vld [vmem:[%s2671_s27 + $0x18] sm:$0xff]   ;;  %2139 = vmatprep.subr.bf16.mxu0 %v2344_v16  ;;  %v2350_v54 = vld [vmem:[%s2671_s27 + $0x70] sm:$0xff]  }
 0x32b   : > { %v2815_v59 = vpop.eup %2382  ;;  %960 = vadd.xlane.f32.xlu0 %v959_v58  ;;  %v2353_v58 = vld [vmem:[%s2671_s27 + $0x38] sm:$0xff]  }
 0x32c   : > { %2388 = vpow2.f32 %v1189_v55  ;;  %v1191_v60 = vmul.f32 1.442695, %v1188_v57  ;;  %v962_v61 = vsel %vm830_vm4, %v2815_v59, 0.0  ;;  %v2351_v55 = vld [vmem:[%s2671_s27 + $0x30] sm:$0xff]   ;;  %v2352_v57 = vld [vmem:[%s2671_s27 + $0x78] sm:$0xff]  }
 0x32d   : > { %963 = vadd.xlane.f32.xlu1 %v962_v61  ;;  %2140 = vmatpush3.bf16.msra.mxu0 %v2345_v17 }
 0x32e   : > { %v2819_v62 = vpop.eup %2384  ;;  %2390 = vpow2.f32 %v1191_v60  ;;  %2141 = vmatprep.subr.bf16.mxu0 %v2346_v18 }
 0x32f   : > { %v1076_v63 = vsel %vm830_vm4, %v2819_v62, 0.0 }
 0x330   : > { %v2823_v0 = vpop.eup %2386  ;;  %1077 = vadd.xlane.f32.xlu0 %v1076_v63 }
 0x331   : > { %v1079_v1 = vsel %vm830_vm4, %v2823_v0, 0.0  ;;  %2142 = vmatpush3.bf16.msra.mxu0 %v2347_v19 }
 0x332   : > { %1080 = vadd.xlane.f32.xlu1 %v1079_v1  ;;  %2143 = vmatprep.subr.bf16.mxu0 %v2348_v30 }
 0x336   : > { %v2827_v2 = vpop.eup %2388 }
 0x337   : > { %v1193_v3 = vsel %vm830_vm4, %v2827_v2, 0.0 }
 0x338   : > { %v2831_v7 = vpop.eup %2390  ;;  %1194 = vadd.xlane.f32.xlu0 %v1193_v3 }
 0x339   : > { %v1196_v8 = vsel %vm830_vm4, %v2831_v7, 0.0 }
 0x33a   : > { %1197 = vadd.xlane.f32.xlu1 %v1196_v8 }
 0x3b4   : > { %v845_v20 = vpop.xlane.xlu0 %844 }
 0x3b5   : > { %2392 = vrcp.f32 %v845_v20 }
 0x3b6   : > { %v848_v21 = vpop.xlane.xlu1 %847 }
 0x3b7   : > { %2394 = vrcp.f32 %v848_v21 }
 0x3b8   : > { %v961_v23 = vpop.xlane.xlu0 %960 }
 0x3b9   : > { %2396 = vrcp.f32 %v961_v23 }
 0x3ba   : > { %v964_v25 = vpop.xlane.xlu1 %963 }
 0x3bb   : > { %2398 = vrcp.f32 %v964_v25 }
 0x3bd   : > { %v1078_v34 = vpop.xlane.xlu0 %1077 }
 0x3be   : > { %2400 = vrcp.f32 %v1078_v34 }
 0x3bf   : > { %v2393_v38 = vpop.eup %2392  ;;  %v1081_v39 = vpop.xlane.xlu1 %1080 }
 0x3c0   : > { %v851_v40 = vmul.f32 %v2393_v38, %v2803_v47  ;;  %2402 = vrcp.f32 %v1081_v39 }
 0x3c1   : > { %v2395_v35 = vpop.eup %2394 }
 0x3c2   : > { %853 = vst.msk [vmem:[%s2685_s13] sm:$0xff] %vm830_vm4, %v851_v40  ;;  %v852_v41 = vmul.f32 %v2395_v35, %v2807_v49 }
 0x3c3   : > { %v2397_v42 = vpop.eup %2396 }
 0x3c4   : > { %854 = vst.msk [vmem:[%s2685_s13 + $0x8] sm:$0xff] %vm830_vm4, %v852_v41  ;;  %v967_v36 = vmul.f32 %v2397_v42, %v2811_v53  ;;  %v855_v37 = vpack.c.bf16 %v852_v41, %v851_v40 }
 0x3c5   : > { %v2399_v43 = vpop.eup %2398  ;;  %v1195_v44 = vpop.xlane.xlu0 %1194 }
 0x3c6   : > { %2052 = vst.msk [vmem:[%s2685_s13 + $0x10] sm:$0xff] %vm830_vm4, %v967_v36  ;;  %v968_v45 = vmul.f32 %v2399_v43, %v2815_v59  ;;  %2404 = vrcp.f32 %v1195_v44  ;;  %2180 = vmatmul.mubr.msk.bf16.vlgmr.msra.gmra.mrb[12].mxu1 %vm830_vm4, %v855_v37 }
 0x3c7   : > { %2190 = vmatpush3.bf16.msra.mxu1 %v771_v27  ;;  %v1198_v46 = vpop.xlane.xlu1 %1197  ;;  %2191 = vmatprep.mubr.msk.bf16.mxu1 %vm2524_vm2, %v2523_v56 }
 0x3c8   : > { %v2401_v47 = vpop.eup %2400  ;;  %2053 = vst.msk [vmem:[%s2685_s13 + $0x18] sm:$0xff] %vm830_vm4, %v968_v45  ;;  %2406 = vrcp.f32 %v1198_v46  ;;  %2201 = vmatprep.subr.bf16.mxu1 %v2523_v56  ;;  %v972_v26 = vpack.c.bf16 %v968_v45, %v967_v36 }
 0x3c9   : > { %v1084_v48 = vmul.f32 %v2401_v47, %v2819_v62  ;;  %v2356_v47 = vld [vmem:[%s2678_s9 + $0x4] ss:$8 sps:$4 sm:$0xff]  }
 0x3ca   : > { %v2403_v49 = vpop.eup %2402 }
 0x3cb   : > { %2055 = vst.msk [vmem:[%s2685_s13 + $0x20] sm:$0xff] %vm830_vm4, %v1084_v48  ;;  %v1085_v22 = vmul.f32 %v2403_v49, %v2823_v0  ;;  %v2357_v49 = vld [vmem:[%s2678_s9 + $0x10] ss:$8 sps:$4 sm:$0xff]  }
 0x3cd   : > { %2056 = vst.msk [vmem:[%s2685_s13 + $0x28] sm:$0xff] %vm830_vm4, %v1085_v22  ;;  %v1089_v53 = vpack.c.bf16 %v1085_v22, %v1084_v48  ;;  %v2354_v48 = vld [vmem:[%s2678_s9] ss:$8 sps:$4 sm:$0xff]  }
 0x3ce   : > { %2192 = vmatmul.mubr.msk.bf16.vlgmr.msra.gmra.mrb[16].mxu1 %vm830_vm4, %v972_v26 }
 0x3cf   : > { %2202 = vmatpush3.bf16.msra.mxu1 %v776_v31  ;;  %2203 = vmatprep.mubr.msk.bf16.mxu1 %vm2524_vm2, %v2523_v56  ;;  %v2349_v31 = vld [vmem:[%s2671_s27 + $0x28] sm:$0xff]  }
 0x3d0   : > { %v2405_v27 = vpop.eup %2404  ;;  %2213 = vmatprep.subr.bf16.mxu1 %v2523_v56  ;;  %2144 = vmatpush3.bf16.msra.mxu0 %v2349_v31 }
 0x3d1   : > { %v1201_v50 = vmul.f32 %v2405_v27, %v2827_v2  ;;  %2145 = vmatprep.subr.bf16.mxu0 %v2350_v54  ;;  %v2077_v54 = vld [vmem:[%s451_s17] ss:$0 sm:$0xff] }
 0x3d2   : > { %v2407_v51 = vpop.eup %2406 }
 0x3d3   : > { %2058 = vst.msk [vmem:[%s2685_s13 + $0x30] sm:$0xff] %vm830_vm4, %v1201_v50  ;;  %v1202_v52 = vmul.f32 %v2407_v51, %v2831_v7 }
 0x3d4   : > { %2146 = vmatpush3.bf16.msra.mxu0 %v2351_v55 }
 0x3d5   : > { %2059 = vst.msk [vmem:[%s2685_s13 + $0x38] sm:$0xff] %vm830_vm4, %v1202_v52  ;;  %v1206_v28 = vpack.c.bf16 %v1202_v52, %v1201_v50  ;;  %2147 = vmatprep.subr.bf16.mxu0 %v2352_v57 }
 0x3d6   : > { %2204 = vmatmul.mubr.msk.bf16.vlgmr.msra.gmra.mrb[20].mxu1 %vm830_vm4, %v1089_v53 }
 0x3d7   : > { %2214 = vmatpush3.bf16.msra.mxu1 %v777_v33  ;;  %2215 = vmatprep.mubr.msk.bf16.mxu1 %vm2524_vm2, %v2523_v56 }
 0x3d8   : > { %2148 = vmatpush3.bf16.msra.mxu0 %v2353_v58  ;;  %1521 = vmatprep.subr.bf16.mxu1 %v2356_v47 }
 0x3de   : > { %2216 = vmatmul.mubr.msk.bf16.vlgmr.msra.gmra.mrb[24].mxu1 %vm830_vm4, %v1206_v28 }
 0x3df   : > { %1553 = vmatprep.mubr.bf16.mxu1 %v2522_v24  ;;  %1522 = vmatpush1.bf16.msra.mxu1 %v2354_v48 }
 0x499   : > { %v893_v29 = vpop.f32.mrb[12].mxu1 }
 0x49a   : > { %v2181_v32 = vpop.f32.mrb[13].mxu1 }
 0x49b   : > { %v896_v56 = vpop.f32.mrb[14].mxu1 }
 0x49c   : > { %v1261_v33 = vpack.c.bf16 %v896_v56, %v893_v29  ;;  %v2182_v59 = vpop.f32.mrb[15].mxu1 }
 0x4a1   : > { %v1010_v60 = vpop.f32.mrb[16].mxu1 }
 0x4a2   : > { %v2193_v61 = vpop.f32.mrb[17].mxu1 }
 0x4a3   : > { %v1013_v62 = vpop.f32.mrb[18].mxu1 }
 0x4a4   : > { %v1262_v63 = vpack.c.bf16 %v1013_v62, %v1010_v60  ;;  %v2194_v0 = vpop.f32.mrb[19].mxu1 }
 0x4a6   : > { %1425 = vmatprep.mubr.bf16.mxu0 %v1262_v63 }
 0x4a7   : > { %1426 = vmatmul.mubr.bf16.vlgmr.msra.gmra.mrb[28].mxu0 %v1261_v33 }
 0x4a9   : > { %v1127_v1 = vpop.f32.mrb[20].mxu1 }
 0x4aa   : > { %v2205_v2 = vpop.f32.mrb[21].mxu1 }
 0x4ab   : > { %v1130_v3 = vpop.f32.mrb[22].mxu1 }
 0x4ac   : > { %v1263_v7 = vpack.c.bf16 %v1130_v3, %v1127_v1  ;;  %v2206_v8 = vpop.f32.mrb[23].mxu1  ;;  %v2360_v3 = vld [vmem:[%s2683_s21] sm:$0xff]  }
 0x4ad   : > { %v2363_v8 = vld [vmem:[%s2683_s21 + $0x18] sm:$0xff]  }
 0x4b1   : > { %v1244_v9 = vpop.f32.mrb[24].mxu1 }
 0x4b2   : > { %v2217_v11 = vpop.f32.mrb[25].mxu1 }
 0x4b3   : > { %v1247_v12 = vpop.f32.mrb[26].mxu1  ;;  %v2365_v11 = vld [vmem:[%s2683_s21 + $0x28] sm:$0xff]  }
 0x4b4   : > { %v1264_v13 = vpack.c.bf16 %v1247_v12, %v1244_v9  ;;  %v2218_v14 = vpop.f32.mrb[27].mxu1  ;;  %v2364_v9 = vld [vmem:[%s2683_s21 + $0x20] sm:$0xff]   ;;  %v2366_v12 = vld [vmem:[%s2683_s21 + $0x30] sm:$0xff]  }
 0x4b6   : > { %1433 = vmatprep.mubr.bf16.mxu0 %v1264_v13  ;;  %v2367_v13 = vld [vmem:[%s2683_s21 + $0x38] sm:$0xff]  }
 0x4b7   : > { %1434 = vmatmul.mubr.bf16.gmra.mrb[32].mxu0 %v1263_v7  ;;  %v2361_v7 = vld [vmem:[%s2683_s21 + $0x8] sm:$0xff]  }
 0x57a   : > { %v2149_v15 = vpop.f32.mrb[28].mxu0 }
 0x57b   : > { %v2150_v16 = vpop.f32.mrb[29].mxu0 }
 0x57c   : > { %v2151_v17 = vadd.f32 %v2150_v16, %v2149_v15  ;;  %v2152_v18 = vpop.f32.mrb[30].mxu0 }
 0x57d   : > { %v2153_v19 = vpop.f32.mrb[31].mxu0 }
 0x57e   : > { %v2898_v20 = vadd.f32 %v2151_v17, %v2700_v4  ;;  %v2154_v21 = vadd.f32 %v2153_v19, %v2152_v18 }
 0x580   : > { %v2901_v23 = vadd.f32 %v2154_v21, %v2702_v5  ;;  %v1447_v25 = vmul.f32 %v2898_v20, %v2898_v20 }
 0x582   : > { %v1451_v34 = vsel %vm487_vm1, %v1447_v25, 0.0  ;;  %v1448_v38 = vmul.f32 %v2901_v23, %v2901_v23 }
 0x583   : > { %1452 = vadd.xlane.f32.xlu0 %v1451_v34 }
 0x584   : > { %v1454_v39 = vsel %vm487_vm1, %v1448_v38, 0.0 }
 0x585   : > { %1455 = vadd.xlane.f32.xlu1 %v1454_v39 }
 0x58a   : > { %v2155_v4 = vpop.f32.mrb[32].mxu0 }
 0x58b   : > { %v2156_v40 = vpop.f32.mrb[33].mxu0 }
 0x58c   : > { %v2157_v35 = vadd.f32 %v2156_v40, %v2155_v4  ;;  %v2158_v5 = vpop.f32.mrb[34].mxu0 }
 0x58d   : > { %v2159_v41 = vpop.f32.mrb[35].mxu0 }
 0x58e   : > { %v2910_v42 = vadd.f32 %v2157_v35, %v2704_v6  ;;  %v2160_v36 = vadd.f32 %v2159_v41, %v2158_v5  ;;  %v2359_v6 = vld [vmem:[%s2678_s9 + $0x14] ss:$8 sps:$4 sm:$0xff]  }
 0x58f   : > { %1523 = vmatprep.subr.bf16.mxu1 %v2359_v6 }
 0x590   : > { %v2913_v37 = vadd.f32 %v2160_v36, %v2712_v10  ;;  %v1449_v43 = vmul.f32 %v2910_v42, %v2910_v42  ;;  %1524 = vmatpush1.bf16.msra.mxu1 %v2357_v49 }
 0x591   : > { %2219 = vmatprep.subr.bf16.mxu1 %v2360_v3 }
 0x592   : > { %v1457_v44 = vsel %vm487_vm1, %v1449_v43, 0.0  ;;  %v1450_v45 = vmul.f32 %v2913_v37, %v2913_v37 }
 0x593   : > { %1458 = vadd.xlane.f32.xlu0 %v1457_v44 }
 0x594   : > { %v1460_v46 = vsel %vm487_vm1, %v1450_v45, 0.0 }
 0x595   : > { %1461 = vadd.xlane.f32.xlu1 %v1460_v46 }
 0x610   : > { %v1453_v10 = vpop.xlane.xlu0 %1452 }
 0x611   : > { %v1463_v22 = vmul.f32 0.03125, %v1453_v10 }
 0x612   : > { %v1456_v26 = vpop.xlane.xlu1 %1455 }
 0x613   : > { %v1467_v27 = vadd.f32 1.1920929e-07, %v1463_v22  ;;  %v1464_v50 = vmul.f32 0.03125, %v1456_v26 }
 0x615   : > { %2408 = vrsqrt.f32 %v1467_v27  ;;  %v1468_v51 = vadd.f32 1.1920929e-07, %v1464_v50 }
 0x617   : > { %2410 = vrsqrt.f32 %v1468_v51 }
 0x61f   : > { %v2409_v52 = vpop.eup %2408 }
 0x620   : > { %v1475_v53 = vmul.f32 %v2409_v52, %v2898_v20  ;;  %v1459_v28 = vpop.xlane.xlu0 %1458 }
 0x621   : > { %v2411_v30 = vpop.eup %2410  ;;  %v1465_v31 = vmul.f32 0.03125, %v1459_v28 }
 0x622   : > { %v1476_v55 = vmul.f32 %v2411_v30, %v2901_v23  ;;  %v1462_v57 = vpop.xlane.xlu1 %1461  ;;  %v1485_v32 = vmul.f32 %v2077_v54, %v1475_v53 }
 0x623   : > { %v1469_v58 = vadd.f32 1.1920929e-07, %v1465_v31  ;;  %v1466_v29 = vmul.f32 0.03125, %v1462_v57 }
 0x624   : > { %v1486_v56 = vmul.f32 %v2077_v54, %v1476_v55 }
 0x625   : > { %2412 = vrsqrt.f32 %v1469_v58  ;;  %v1470_v33 = vadd.f32 1.1920929e-07, %v1466_v29 }
 0x626   : > { %v1489_v59 = vpack.c.bf16 %v1486_v56, %v1485_v32 }
 0x627   : > { %2414 = vrsqrt.f32 %v1470_v33 }
 0x628   : > { %2082 = vmatmul.mubr.msk.bf16.vlgmr.msra.gmra.mrb[28].mxu1 %vm487_vm1, %v1489_v59 }
 0x629   : > { %1563 = vmatprep.mubr.bf16.mxu1 %v2522_v24  ;;  %2220 = vmatpush3.bf16.msra.mxu1 %v2360_v3  ;;  %v2362_v24 = vld [vmem:[%s2683_s21 + $0x10] sm:$0xff]  }
 0x62a   : > { %2221 = vmatprep.subr.bf16.mxu1 %v2361_v7 }
 0x62d   : > { %2222 = vmatpush3.bf16.msra.mxu1 %v2361_v7 }
 0x62e   : > { %2223 = vmatprep.subr.bf16.mxu1 %v2362_v24 }
 0x62f   : > { %v2413_v60 = vpop.eup %2412 }
 0x630   : > { %v1477_v61 = vmul.f32 %v2413_v60, %v2910_v42 }
 0x631   : > { %v2415_v62 = vpop.eup %2414  ;;  %2224 = vmatpush3.bf16.msra.mxu1 %v2362_v24 }
 0x632   : > { %v1478_v63 = vmul.f32 %v2415_v62, %v2913_v37  ;;  %v1487_v0 = vmul.f32 %v2077_v54, %v1477_v61  ;;  %2225 = vmatprep.subr.bf16.mxu1 %v2363_v8 }
 0x634   : > { %v1488_v1 = vmul.f32 %v2077_v54, %v1478_v63 }
 0x635   : > { %2226 = vmatpush3.bf16.msra.mxu1 %v2363_v8 }
 0x636   : > { %v1490_v2 = vpack.c.bf16 %v1488_v1, %v1487_v0  ;;  %2227 = vmatprep.subr.bf16.mxu1 %v2364_v9 }
 0x638   : > { %2083 = vmatmul.mubr.msk.bf16.gmra.mrb[32].mxu1 %vm487_vm1, %v1490_v2 }
 0x639   : > { %2228 = vmatpush3.bf16.msra.mxu1 %v2364_v9 }
 0x63a   : > { %2229 = vmatprep.subr.bf16.mxu1 %v2365_v11 }
 0x63d   : > { %2230 = vmatpush3.bf16.msra.mxu1 %v2365_v11 }
 0x63e   : > { %2231 = vmatprep.subr.bf16.mxu1 %v2366_v12 }
 0x641   : > { %2232 = vmatpush3.bf16.msra.mxu1 %v2366_v12 }
 0x642   : > { %2233 = vmatprep.subr.bf16.mxu1 %v2367_v13 }
 0x645   : > { %2234 = vmatpush3.bf16.msra.mxu1 %v2367_v13  ;;  %v2097_v13 = vld [vmem:[%s3033_s7] ss:$0 sm:$0xff] (!%p2096_p13) }
 0x6fb   : > { %v1555_v14 = vpop.f32.mrb[28].mxu1 }
 0x6fc   : > { %v2084_v15 = vmul.f32 -1.442695, %v1555_v14  ;;  %v1557_v16 = vpop.f32.mrb[29].mxu1 }
 0x6fd   : > { %v1559_v17 = vpop.f32.mrb[30].mxu1 }
 0x6fe   : > { %2416 = vpow2.f32 %v2084_v15  ;;  %v2085_v18 = vmul.f32 -1.442695, %v1559_v17  ;;  %v1561_v19 = vpop.f32.mrb[31].mxu1 }
 0x700   : > { %2418 = vpow2.f32 %v2085_v18 }
 0x708   : > { %v2417_v21 = vpop.eup %2416 }
 0x709   : > { %v1586_v25 = vadd.f32 1.0, %v2417_v21 }
 0x70a   : > { %v2419_v34 = vpop.eup %2418 }
 0x70b   : > { %2420 = vrcp.f32 %v1586_v25  ;;  %v1587_v38 = vadd.f32 1.0, %v2419_v34  ;;  %v1565_v39 = vpop.f32.mrb[32].mxu1 }
 0x70c   : > { %v2086_v4 = vmul.f32 -1.442695, %v1565_v39  ;;  %v1567_v40 = vpop.f32.mrb[33].mxu1 }
 0x70d   : > { %2422 = vrcp.f32 %v1587_v38  ;;  %v1569_v35 = vpop.f32.mrb[34].mxu1 }
 0x70e   : > { %2424 = vpow2.f32 %v2086_v4  ;;  %v2087_v5 = vmul.f32 -1.442695, %v1569_v35  ;;  %v1571_v41 = vpop.f32.mrb[35].mxu1 }
 0x710   : > { %2426 = vpow2.f32 %v2087_v5 }
 0x715   : > { %v2421_v36 = vpop.eup %2420 }
 0x716   : > { %v1598_v43 = vmul.f32 %v2421_v36, %v1555_v14 }
 0x717   : > { %v2423_v44 = vpop.eup %2422 }
 0x718   : > { %v2425_v45 = vpop.eup %2424  ;;  %v1602_v46 = vmul.f32 %v1598_v43, %v1557_v16  ;;  %v1599_v47 = vmul.f32 %v2423_v44, %v1559_v17 }
 0x719   : > { %v1588_v48 = vadd.f32 1.0, %v2425_v45 }
 0x71a   : > { %v2427_v6 = vpop.eup %2426  ;;  %v1603_v49 = vmul.f32 %v1599_v47, %v1561_v19 }
 0x71b   : > { %2428 = vrcp.f32 %v1588_v48  ;;  %v1589_v10 = vadd.f32 1.0, %v2427_v6 }
 0x71c   : > { %v1606_v22 = vpack.c.bf16 %v1603_v49, %v1602_v46 }
 0x71d   : > { %2430 = vrcp.f32 %v1589_v10 }
 0x71e   : > { %2235 = vmatprep.mubr.bf16.mxu1 %v1606_v22 }
 0x725   : > { %v2429_v26 = vpop.eup %2428 }
 0x726   : > { %v1600_v27 = vmul.f32 %v2429_v26, %v1565_v39 }
 0x727   : > { %v2431_v50 = vpop.eup %2430 }
 0x728   : > { %v1604_v51 = vmul.f32 %v1600_v27, %v1567_v40  ;;  %v1601_v52 = vmul.f32 %v2431_v50, %v1569_v35 }
 0x72a   : > { %v1605_v53 = vmul.f32 %v1601_v52, %v1571_v41 }
 0x72c   : > { %v1607_v28 = vpack.c.bf16 %v1605_v53, %v1604_v51 }
 0x72e   : > { %2236 = vmatmul.mubr.bf16.vlgmr.msra.gmra.mrb[36].mxu1 %v1607_v28 }
 0x801   : > { %v2237_v30 = vpop.f32.mrb[36].mxu1  ;;  %1732 = sbr.rel (%p2096_p13) target bundleno = 2224 (0x8b0), region = 60 }
 0x802   : > { %v1723_v31 = vadd.f32 %v2237_v30, %v2910_v42  ;;  %v1706_v54 = vpop.f32.mrb[37].mxu1 }
 0x803   : > { %v1721_v55 = vadd.f32 %v1706_v54, %v2898_v20  ;;  %v2238_v57 = vpop.f32.mrb[38].mxu1 }
 0x804   : > { %1727 = vst.msk [vmem:[#allocation2 + $0x10] sm:$0xff] %vm487_vm1, %v1723_v31  ;;  %v1724_v58 = vadd.f32 %v2238_v57, %v2913_v37  ;;  %v1709_v29 = vpop.f32.mrb[39].mxu1  ;;  %v1736_v42 = vmul.f32 (!%p2096_p13), %v1723_v31, %v1723_v31 }
 0x805   : > { %1725 = vst.msk [vmem:[#allocation2] sm:$0xff] %vm487_vm1, %v1721_v55  ;;  %v1722_v32 = vadd.f32 %v1709_v29, %v2901_v23  ;;  %v1734_v56 = vmul.f32 (!%p2096_p13), %v1721_v55, %v1721_v55 }
 0x806   : > { %1728 = vst.msk [vmem:[#allocation2 + $0x18] sm:$0xff] %vm487_vm1, %v1724_v58  ;;  %v1737_v20 = vmul.f32 (!%p2096_p13), %v1724_v58, %v1724_v58  ;;  %v1744_v59 = vsel (!%p2096_p13), %vm487_vm1, %v1736_v42, 0.0 }
 0x807   : > { %1726 = vst.msk [vmem:[#allocation2 + $0x8] sm:$0xff] %vm487_vm1, %v1722_v32  ;;  %v1735_v33 = vmul.f32 (!%p2096_p13), %v1722_v32, %v1722_v32  ;;  %v1738_v37 = vsel (!%p2096_p13), %vm487_vm1, %v1734_v56, 0.0  ;;  %1745 = vadd.xlane.f32.xlu1 (!%p2096_p13), %v1744_v59 }
 0x808   : > { %1739 = vadd.xlane.f32.xlu0 %v1738_v37  ;;  %v1747_v60 = vsel %vm487_vm1, %v1737_v20, 0.0 }
 0x809   : > { %v1741_v23 = vsel %vm487_vm1, %v1735_v33, 0.0 }
 0x80b   : > { %1748 = vadd.xlane.f32.xlu1 %v1747_v60 }
 0x80c   : > { %1742 = vadd.xlane.f32.xlu0 %v1741_v23 }
 0x894   : > { %v1746_v61 = vpop.xlane.xlu1 %1745 }
 0x895   : > { %v1740_v62 = vpop.xlane.xlu0 %1739  ;;  %v1752_v63 = vmul.f32 0.03125, %v1746_v61 }
 0x896   : > { %v1750_v0 = vmul.f32 0.03125, %v1740_v62 }
 0x897   : > { %v1756_v1 = vadd.f32 1.1920929e-07, %v1752_v63 }
 0x898   : > { %v1754_v2 = vadd.f32 1.1920929e-07, %v1750_v0  ;;  %v1749_v3 = vpop.xlane.xlu1 %1748 }
 0x899   : > { %v1743_v7 = vpop.xlane.xlu0 %1742  ;;  %2432 = vrsqrt.f32 %v1756_v1  ;;  %v1753_v24 = vmul.f32 0.03125, %v1749_v3 }
 0x89a   : > { %v1751_v8 = vmul.f32 0.03125, %v1743_v7  ;;  %2434 = vrsqrt.f32 %v1754_v2 }
 0x89b   : > { %v1757_v9 = vadd.f32 1.1920929e-07, %v1753_v24 }
 0x89c   : > { %v1755_v11 = vadd.f32 1.1920929e-07, %v1751_v8 }
 0x89d   : > { %2436 = vrsqrt.f32 %v1757_v9 }
 0x89e   : > { %2438 = vrsqrt.f32 %v1755_v11 }
 0x8a3   : > { %v2433_v12 = vpop.eup %2432 }
 0x8a4   : > { %v2435_v14 = vpop.eup %2434  ;;  %v1764_v15 = vmul.f32 %v2433_v12, %v1723_v31 }
 0x8a5   : > { %v1762_v16 = vmul.f32 %v2435_v14, %v1721_v55 }
 0x8a6   : > { %v1774_v17 = vmul.f32 %v2097_v13, %v1764_v15 }
 0x8a7   : > { %v2437_v18 = vpop.eup %2436  ;;  %v1772_v19 = vmul.f32 %v2097_v13, %v1762_v16 }
 0x8a8   : > { %v2439_v21 = vpop.eup %2438  ;;  %v2114_v25 = vpack.c.bf16 %v1774_v17, %v1774_v17  ;;  %v1765_v34 = vmul.f32 %v2437_v18, %v1724_v58 }
 0x8a9   : > { %v2112_v38 = vpack.c.bf16 %v1772_v19, %v1772_v19  ;;  %v1763_v39 = vmul.f32 %v2439_v21, %v1722_v32 }
 0x8aa   : > { %1795 = vst.msk [vmem:[#allocation4 + $0x8] sm:$0xf] %vm1792_vm6, %v2114_v25  ;;  %v1775_v4 = vmul.f32 %v2097_v13, %v1765_v34 }
 0x8ab   : > { %1793 = vst.msk [vmem:[#allocation4] sm:$0xf] %vm1792_vm6, %v2112_v38  ;;  %v1773_v40 = vmul.f32 %v2097_v13, %v1763_v39 }
 0x8ac   : > { %v2115_v35 = vpack.c.bf16 %v1775_v4, %v1775_v4 }
 0x8ad   : > { %v2113_v5 = vpack.c.bf16 %v1773_v40, %v1773_v40 }
 0x8ae   : > { %1796 = vst.msk [vmem:[#allocation4 + $0xc] sm:$0xf] %vm1792_vm6, %v2115_v35 }
 0x8af   : > { %1794 = vst.msk [vmem:[#allocation4 + $0x4] sm:$0xf] %vm1792_vm6, %v2113_v5 }
 0x8b0 PF: > { %s2525_s26 = smov [#allocation4]  }
 0x8b1   : > { %s1812_s18 = sshll.u32 %s2525_s26, 4  ;;  %s1813_s18 = int_to_ptr.vmem [resolvable:$true] %s1812_s18 }
 0x8b2   : > { %s2440_s21 = scalar_lea.vmem %s1813_s18, 256  ;;  %p2447_p5 = scmp.lt.s32.totalorder %s1813_s18, %s1813_s18 }
 0x8b3   : > { %p2441_p0 = scmp.ne.s32.totalorder %s1813_s18, %s2440_s21  ;;  %p2448_p6 = scmp.lt.s32.totalorder %s2440_s21, %s2440_s21 }
 0x8b5   : > { %p2442_p1 = pnand %p2441_p0, %p2621_p2  ;;  %p2449_p7 = por %p2448_p6, %p2447_p5 }
 0x8b7   : > { %p2443_p3 = pneg %p2442_p1 }
 0x8b9   : > { %p2450_p9 = pnand %p2449_p7, %p2443_p3 }
 0x8bb   : > { %2453 = shalt.err (!%p2450_p9)
}
 0x8bc   : > { %s2454_s24 = scalar_lea.hbm %s3034_s8, 256 }
 0x8bd   : > { %p2455_p10 = scmp.ne.s32.totalorder %s3034_s8, %s2454_s24  ;;  %p2460_p13 = scmp.lt.u32.totalorder %s2454_s24, %s3034_s8 }
 0x8bf   : > { %p2456_p11 = pnand %p2455_p10, %p2621_p2 }
 0x8c1   : > { %p2457_p12 = pneg %p2456_p11 }
 0x8c3   : > { %p2462_p0 = pnand %p2460_p13, %p2457_p12 }
 0x8c5   : > { %2465 = shalt.err (!%p2462_p0)
}
 0x8c6   : > { %s2526_s20 = smov 64   ;;  %s2527_s25 = smov 4  }
 0x8c7   : > { %2241 = dma.vmem_to_hbm [thread:$0]  (%p2621_p2), %s1813_s18, 256, %s3034_s8, [#allocation5], %s2526_s20, %s2526_s20, %s2527_s25  }
 0x8c8   : > { %s3059_s23 = sand.u32 1, %s2504_s10  }
 0x8c9   : > { %s1798_s27 = scalar_lea.sflag [#allocation7], %s3059_s23 }
 0x8ca   : > { %s2116_s17 = sshll.u32 %s2512_s12, 9  ;;  %s1847_s26 = sshll.u32 %s2685_s13, 4  ;;  %s1848_s26 = int_to_ptr.vmem [resolvable:$true] %s1847_s26 }
 0x8cb   : > { %s3061_s22 = sld [smem:[#allocation20_spill]]  ;;  %s2528_s15 = smov 512  }
 0x8cc   : > { %2242 = sst [smem:[#allocation9]] (%p2631_p4), %s2528_s15  ;;  %s2529_s18 = smov 1024  }
 0x8cd   : > { %2243 = sst [smem:[#allocation9 + $0x1]] (%p2631_p4), %s2529_s18  ;;  %s2530_s14 = smov 4  }
 0x8ce   : > { %2244 = sst [smem:[#allocation9 + $0x2]] (%p2631_p4), %s2530_s14  ;;  %s2531_s29 = smov 128  }
 0x8cf   : > { %2245 = sst [smem:[#allocation9 + $0x3]] (%p2631_p4), %s2531_s29  ;;  %s2532_s12 = smov 8  }
 0x8d0   : > { %2246 = sst [smem:[#allocation9 + $0x4]] (%p2631_p4), %s2531_s29  ;;  %s2533_s13 = smov [#allocation8]  }
 0x8d1   : > { %s1830_s24 = scalar_lea.hbm %s3061_s22, %s2116_s17  ;;  %2247 = sst [smem:[#allocation9 + $0x5]] (%p2631_p4), %s2532_s12 }
 0x8d2   : > { %s2534_s30 = smov 0  }
 0x8d3   : > { %2248 = dma.general (%p2631_p4), %s1848_s26, 1024, %s1830_s24, %s1798_s27, %s2533_s13, [#allocation9], %s2534_s30, 0  }
 0x8d4   : > { %2491 = dma.done.wait (%p2621_p2), [#allocation5], 256  }
 0x8d5   : > { %2493 = vsyncadd (%p2621_p2), [#allocation5], 4294967040 }
 0x8d6 PF: > { %s3062_s20 = sld [smem:[#allocation15_spill]]  ;;  %s3063_s25 = sld [smem:[#allocation12_spill]] }
 0x8dc   : > { %p2258_p1 = scmp.ge.s32.totalorder %s3062_s20, 2  ;;  %s1879_s28 = sand.u32 1, %s3063_s25  }
 0x8dd   : > { %s1880_s23 = scalar_lea.sflag [#allocation7], %s1879_s28 }
 0x8de   : > { %p2253_p3 = pnand %p2258_p1, %p2638_p8 }
 0x8e0   : > { %2495 = dma.done.wait (!%p2253_p3), %s1880_s23, 1024  }
 0x8e1   : > { %2497 = vsyncadd (!%p2253_p3), %s1880_s23, 4294966272  ;;  %s24_s14 = sadd.s32 1, %s3062_s20   ;;  %s3065_s27 = sld [smem:[#allocation13_spill]] }
 0x8e2   : > { %p21_p4 = scmp.ge.s32.totalorder %s24_s14, 4   ;;  %s3066_s11 = sld [smem:[#allocation19_spill]] }
 0x8e3   : > { %s3067_s12 = sld [smem:[#allocation14_spill]]  ;;  %s3068_s13 = sld [smem:[#allocation16_spill]] }
 0x8e4   : > { %s3069_s30 = smov %s2504_s10  ;;  %23 = sbr.rel (!%p21_p4) target bundleno = 7 (0x7), region = 131 }
 0x8e7   : > { %s3070_s10 = smov %s3065_s27 }
 0x8eb   :  { %1885 = vsyncpa [#allocation5], 1 }
 0x8ec   :  { %1887 = vsyncpa [#allocation5 + $0x1], 1 }
 0x8ed   :  { %1888 = vsyncpa [#allocation7], 1 }
 0x8ee   :  { %1890 = vsyncpa [#allocation7 + $0x1], 1 }

</bundles_post_ra>
